<compile_context>
chip_gen: v6e
topology: v6e:2x2x1
jax: 0.10.0
libtpu: 0.0.40
codegen_flags: <defaults>
</compile_context>

<pallas_src>
import functools

import jax
import jax.numpy as jnp
from jax import lax
from jax.experimental import pallas as pl
from jax.experimental.pallas import tpu as pltpu

LANE = 128
SUBLANE = 8


def _round_up(n, m):
    return ((n + m - 1) // m) * m


# ---------------------------------------------------------------------------
# One-time parameter preparation (hoisted out of the per-step call path).
# PyTorch shapes in `params`: lin_x_w (3H, I), lin_x_b (3H,), lin_h{r,z,h}_w (H, H).
# Chunk order of lin_x along its output dim is (xr, xz, xh), matching torch.chunk.
# ---------------------------------------------------------------------------
def prepare_params(params, input_size, hidden_size, weight_dtype=jnp.bfloat16):
    """Fuse / transpose / lane-pad weights once.

    Returns:
      wx3  (I, 3*Hp)   columns = [r | z | h], weight_dtype
      bx3  (1, 3*Hp)   float32 (added after the f32 accumulate)
      whrz (Hp, 2*Hp)  columns = [r | z],     weight_dtype
      whh  (Hp, Hp)                            weight_dtype
    Padding is exact: padded weight rows/cols and biases are zero, so padded
    hidden lanes provably stay zero through every update.
    """
    H = hidden_size
    Hp = _round_up(H, LANE)

    wx_t = params["lin_x_w"].T.astype(jnp.float32)        # (I, 3H)
    bx = params["lin_x_b"].astype(jnp.float32)             # (3H,)

    def pad_cols(w):                                        # (I, H) -> (I, Hp)
        return jnp.pad(w, ((0, 0), (0, Hp - H)))

    wx3 = jnp.concatenate(
        [pad_cols(wx_t[:, :H]),
         pad_cols(wx_t[:, H:2 * H]),
         pad_cols(wx_t[:, 2 * H:])], axis=1).astype(weight_dtype)   # (I, 3*Hp)

    bx3 = jnp.concatenate(
        [jnp.pad(bx[:H], (0, Hp - H)),
         jnp.pad(bx[H:2 * H], (0, Hp - H)),
         jnp.pad(bx[2 * H:], (0, Hp - H))]).reshape(1, 3 * Hp)       # f32

    def pad_hh(w):                                          # torch (out,in) -> (in,out)
        return jnp.pad(w.T.astype(jnp.float32), ((0, Hp - H), (0, Hp - H)))

    whrz = jnp.concatenate([pad_hh(params["lin_hr_w"]),
                            pad_hh(params["lin_hz_w"])],
                           axis=1).astype(weight_dtype)               # (Hp, 2*Hp)
    whh = pad_hh(params["lin_hh_w"]).astype(weight_dtype)             # (Hp, Hp)

    return {"wx3": wx3, "bx3": bx3, "whrz": whrz, "whh": whh,
            "H": H, "Hp": Hp, "I": input_size}


# ---------------------------------------------------------------------------
# Kernel math (shared by the single-step and multi-step kernels).
# ---------------------------------------------------------------------------
def _sigmoid(x):
    # sigmoid(x) == 0.5*(1+tanh(x/2)): a single EUP push per element (tanh)
    # instead of exp + reciprocal; the extra mul/add rides the VALU slots.
    return 0.5 * (1.0 + jnp.tanh(0.5 * x))


def _gate_update(dt, h, lin_x, whrz, whh, hp):
    """One GRU-ODE update.  h / lin_x are f32; whrz/whh may be bf16.

    All matmuls accumulate in f32 (preferred_element_type); the hidden dim is
    zero-padded to `hp` lanes and padded lanes stay exactly 0.
    """
    wdt = whrz.dtype
    xr = lin_x[:, :hp]
    xz = lin_x[:, hp:2 * hp]
    xh = lin_x[:, 2 * hp:]

    hrz = jnp.dot(h.astype(wdt), whrz, preferred_element_type=jnp.float32)
    r = _sigmoid(xr + hrz[:, :hp])
    z = _sigmoid(xz + hrz[:, hp:])

    hh = jnp.dot((r * h).astype(wdt), whh, preferred_element_type=jnp.float32)
    u = jnp.tanh(xh + hh)

    return h + dt * (1.0 - z) * (u - h)


def _gru_ode_step_kernel(dt_ref, x_ref, h_ref, wx3_ref, bx3_ref, whrz_ref,
                         whh_ref, out_ref, *, hp):
    """Single GRU-ODE step for one batch tile; weights are constant blocks."""
    dt = dt_ref[0, 0]
    x = x_ref[...].astype(wx3_ref.dtype)
    h = h_ref[...].astype(jnp.float32)
    lin_x = (jnp.dot(x, wx3_ref[...], preferred_element_type=jnp.float32)
             + bx3_ref[...])
    out_ref[...] = _gate_update(dt, h, lin_x, whrz_ref[...], whh_ref[...],
                                hp).astype(out_ref.dtype)


def _lin_x_kernel(x_ref, wx3_ref, bx3_ref, out_ref):
    """x-side affine (constant over the ODE time loop), computed once."""
    x = x_ref[...].astype(wx3_ref.dtype)
    out_ref[...] = (jnp.dot(x, wx3_ref[...], preferred_element_type=jnp.float32)
                    + bx3_ref[...])


def _gru_ode_integrate_kernel(dt_ref, linx_ref, h0_ref, whrz_ref, whh_ref,
                              out_ref, *, hp, num_steps, unroll):
    """T ODE steps for one batch tile via an in-kernel fori_loop (no per-step
    grid overhead); weights / lin_x loaded into VMEM exactly once."""
    dt = dt_ref[0, 0]
    lin_x = linx_ref[...]          # f32, constant across steps
    whrz = whrz_ref[...]
    whh = whh_ref[...]
    h0 = h0_ref[...].astype(jnp.float32)

    def body(_, h):
        return _gate_update(dt, h, lin_x, whrz, whh, hp)

    h_final = lax.fori_loop(0, num_steps, body, h0, unroll=unroll)
    out_ref[...] = h_final.astype(out_ref.dtype)


# ---------------------------------------------------------------------------
# Wrappers
# ---------------------------------------------------------------------------
def _mosaic_params():
    return pltpu.CompilerParams(dimension_semantics=("parallel",),
                                vmem_limit_bytes=64 * 1024 * 1024)


def _batch_tiling(batch, batch_tile):
    bt = batch_tile if batch >= batch_tile else _round_up(batch, SUBLANE)
    bp = _round_up(batch, bt)
    return bt, bp


def full_gru_ode_cell(x, h, prepared, delta_t, *, batch_tile=128):
    """One GRU-ODE step (== FullGRUODECell.forward)."""
    B, I = x.shape
    H, Hp = prepared["H"], prepared["Hp"]
    bt, Bp = _batch_tiling(B, batch_tile)

    x_p = jnp.pad(x, ((0, Bp - B), (0, 0)))
    h_p = jnp.pad(h, ((0, Bp - B), (0, Hp - H)))
    dt = jnp.asarray(delta_t, jnp.float32).reshape(1, 1)

    const = lambda shape: pl.BlockSpec(shape, lambda b: (0,) * len(shape))

    out = pl.pallas_call(
        functools.partial(_gru_ode_step_kernel, hp=Hp),
        out_shape=jax.ShapeDtypeStruct((Bp, Hp), h.dtype),
        grid=(Bp // bt,),
        in_specs=[
            pl.BlockSpec(memory_space=pltpu.MemorySpace.SMEM),     # delta_t
            pl.BlockSpec((bt, I), lambda b: (b, 0)),               # x  (batch-tiled)
            pl.BlockSpec((bt, Hp), lambda b: (b, 0)),              # h  (batch-tiled, padded)
            const((I, 3 * Hp)),                                    # wx3  (resident)
            const((1, 3 * Hp)),                                    # bx3  (resident)
            const((Hp, 2 * Hp)),                                   # whrz (resident)
            const((Hp, Hp)),                                       # whh  (resident)
        ],
        out_specs=pl.BlockSpec((bt, Hp), lambda b: (b, 0)),
        compiler_params=_mosaic_params(),
    )(dt, x_p, h_p, prepared["wx3"], prepared["bx3"], prepared["whrz"],
      prepared["whh"])
    return out[:B, :H]


def full_gru_ode_integrate(x, h, prepared, delta_t, num_steps, *,
                           batch_tile=128):
    """Apply the GRU-ODE step `num_steps` times with fixed x.

    lin_x = x@Wx + bx is hoisted out of the time loop (constant in t) into a
    tiny one-shot pallas_call; the time loop itself runs as an in-kernel
    fori_loop inside ONE pallas_call per batch tile (batch axis "parallel").
    """
    B, I = x.shape
    H, Hp = prepared["H"], prepared["Hp"]
    bt, Bp = _batch_tiling(B, batch_tile)
    nb = Bp // bt

    x_p = jnp.pad(x, ((0, Bp - B), (0, 0)))
    h_p = jnp.pad(h, ((0, Bp - B), (0, Hp - H)))
    dt = jnp.asarray(delta_t, jnp.float32).reshape(1, 1)

    const = lambda shape: pl.BlockSpec(shape, lambda b: (0,) * len(shape))

    # --- x-side affine: computed once, outside the time loop ----------------
    lin_x = pl.pallas_call(
        _lin_x_kernel,
        out_shape=jax.ShapeDtypeStruct((Bp, 3 * Hp), jnp.float32),
        grid=(nb,),
        in_specs=[pl.BlockSpec((bt, I), lambda b: (b, 0)),
                  const((I, 3 * Hp)),
                  const((1, 3 * Hp))],
        out_specs=pl.BlockSpec((bt, 3 * Hp), lambda b: (b, 0)),
        compiler_params=_mosaic_params(),
    )(x_p, prepared["wx3"], prepared["bx3"])

    # --- T-step integration --------------------------------------------------
    wbytes = jnp.dtype(prepared["whrz"].dtype).itemsize
    cost = pl.CostEstimate(
        flops=int(num_steps * Bp * (6 * Hp * Hp + 12 * Hp)),
        transcendentals=int(num_steps * Bp * 3 * Hp),
        bytes_accessed=int(Bp * 3 * Hp * 4 + 2 * Bp * Hp * 4
                           + (Hp * 2 * Hp + Hp * Hp) * wbytes),
    )

    out = pl.pallas_call(
        functools.partial(_gru_ode_integrate_kernel, hp=Hp,
                          num_steps=num_steps, unroll=num_steps <= 8),
        out_shape=jax.ShapeDtypeStruct((Bp, Hp), h.dtype),
        grid=(nb,),
        in_specs=[
            pl.BlockSpec(memory_space=pltpu.MemorySpace.SMEM),     # delta_t
            pl.BlockSpec((bt, 3 * Hp), lambda b: (b, 0)),          # lin_x (batch-tiled)
            pl.BlockSpec((bt, Hp), lambda b: (b, 0)),              # h0    (batch-tiled)
            const((Hp, 2 * Hp)),                                   # whrz  (resident)
            const((Hp, Hp)),                                       # whh   (resident)
        ],
        out_specs=pl.BlockSpec((bt, Hp), lambda b: (b, 0)),
        compiler_params=_mosaic_params(),
        cost_estimate=cost,
    )(dt, lin_x, h_p, prepared["whrz"], prepared["whh"])
    return out[:B, :H]


# ---------------------------------------------------------------------------
# Pure-JAX reference mirroring the PyTorch forward exactly.
# ---------------------------------------------------------------------------
def _reference(x, h, params, delta_t):
    lin_x = x @ params["lin_x_w"].T + params["lin_x_b"]
    H = h.shape[1]
    xr, xz, xh = lin_x[:, :H], lin_x[:, H:2 * H], lin_x[:, 2 * H:]
    r = jax.nn.sigmoid(xr + h @ params["lin_hr_w"].T)
    z = jax.nn.sigmoid(xz + h @ params["lin_hz_w"].T)
    u = jnp.tanh(xh + (r * h) @ params["lin_hh_w"].T)
    dh = (1.0 - z) * (u - h)
    return h + delta_t * dh


def _init_params(key, input_size, hidden_size):
    k1, k2, k3, k4, k5 = jax.random.split(key, 5)
    bx = 1.0 / jnp.sqrt(input_size)
    bh = 1.0 / jnp.sqrt(hidden_size)
    return {
        "lin_x_w": jax.random.uniform(k1, (3 * hidden_size, input_size),
                                      jnp.float32, -bx, bx),
        "lin_x_b": jax.random.uniform(k2, (3 * hidden_size,),
                                      jnp.float32, -bx, bx),
        "lin_hh_w": jax.random.uniform(k3, (hidden_size, hidden_size),
                                       jnp.float32, -bh, bh),
        "lin_hz_w": jax.random.uniform(k4, (hidden_size, hidden_size),
                                       jnp.float32, -bh, bh),
        "lin_hr_w": jax.random.uniform(k5, (hidden_size, hidden_size),
                                       jnp.float32, -bh, bh),
    }


if __name__ == "__main__":
    batch = 256            # fill the MXU rows (2 parallel batch tiles of 128)
    input_size = 16
    hidden_size = 32
    delta_t = 0.05
    num_steps = 5

    key = jax.random.PRNGKey(0)
    kp, kx, kh = jax.random.split(key, 3)
    params = _init_params(kp, input_size, hidden_size)

    x = jax.random.normal(kx, (batch, input_size), jnp.float32)
    h = jax.random.normal(kh, (batch, hidden_size), jnp.float32)

    ref1 = _reference(x, h, params, delta_t)
    refT = h
    for _ in range(num_steps):
        refT = _reference(x, refT, params, delta_t)

    # --- exactness check with f32 weights -----------------------------------
    prep32 = prepare_params(params, input_size, hidden_size,
                            weight_dtype=jnp.float32)
    out1 = jax.block_until_ready(full_gru_ode_cell(x, h, prep32, delta_t))
    assert out1.shape == (batch, hidden_size)
    assert jnp.allclose(out1, ref1, atol=1e-5, rtol=1e-5), "f32 single-step mismatch"

    outT = jax.block_until_ready(
        full_gru_ode_integrate(x, h, prep32, delta_t, num_steps))
    assert jnp.allclose(outT, refT, atol=1e-4, rtol=1e-4), "f32 multi-step mismatch"

    # --- default fast path: bf16 weights, f32 accumulate ---------------------
    prep16 = prepare_params(params, input_size, hidden_size)   # bf16 weights
    out1b = jax.block_until_ready(full_gru_ode_cell(x, h, prep16, delta_t))
    assert jnp.allclose(out1b, ref1, atol=5e-2, rtol=5e-2), "bf16 single-step mismatch"

    outTb = jax.block_until_ready(
        full_gru_ode_integrate(x, h, prep16, delta_t, num_steps))
    assert jnp.allclose(outTb, refT, atol=5e-2, rtol=5e-2), "bf16 multi-step mismatch"

    print("KERNEL_OK")
</pallas_src>

<mosaic_0001>
module attributes {stable_mosaic.version = 11 : i64} {
  func.func @_gru_ode_step_kernel(%arg0: i32, %arg1: memref<1x1xf32, #tpu.memory_space<smem>>, %arg2: memref<128x16xf32, #tpu.memory_space<vmem>>, %arg3: memref<128x128xf32, #tpu.memory_space<vmem>>, %arg4: memref<16x384xf32, #tpu.memory_space<vmem>>, %arg5: memref<1x384xf32, #tpu.memory_space<vmem>>, %arg6: memref<128x256xf32, #tpu.memory_space<vmem>>, %arg7: memref<128x128xf32, #tpu.memory_space<vmem>>, %arg8: memref<128x128xf32, #tpu.memory_space<vmem>>) attributes {dimension_semantics = [#tpu.dimension_semantics<parallel>], iteration_bounds = array<i64: 2>, scalar_prefetch = 0 : i64, scratch_operands = 0 : i64, tpu.core_type = #tpu.core_type<tc>, window_params = [{transform_indices = @transform_0, window_bounds = array<i64: 1, 1>}, {transform_indices = @transform_1, window_bounds = array<i64: 128, 16>}, {transform_indices = @transform_2, window_bounds = array<i64: 128, 128>}, {pipeline_mode = #tpu.pipeline_mode<synchronous>, transform_indices = @transform_3, window_bounds = array<i64: 16, 384>}, {pipeline_mode = #tpu.pipeline_mode<synchronous>, transform_indices = @transform_4, window_bounds = array<i64: 1, 384>}, {pipeline_mode = #tpu.pipeline_mode<synchronous>, transform_indices = @transform_5, window_bounds = array<i64: 128, 256>}, {pipeline_mode = #tpu.pipeline_mode<synchronous>, transform_indices = @transform_6, window_bounds = array<i64: 128, 128>}, {transform_indices = @transform_7, window_bounds = array<i64: 128, 128>}]} {
    %c0 = arith.constant 0 : index
    %c0_0 = arith.constant 0 : index
    %0 = memref.load %arg1[%c0, %c0_0] : memref<1x1xf32, #tpu.memory_space<smem>>
    %c0_1 = arith.constant 0 : index
    %c0_2 = arith.constant 0 : index
    %1 = vector.load %arg2[%c0_1, %c0_2] : memref<128x16xf32, #tpu.memory_space<vmem>>, vector<128x16xf32>
    %c0_3 = arith.constant 0 : index
    %c0_4 = arith.constant 0 : index
    %2 = vector.load %arg3[%c0_3, %c0_4] : memref<128x128xf32, #tpu.memory_space<vmem>>, vector<128x128xf32>
    %c0_5 = arith.constant 0 : index
    %c0_6 = arith.constant 0 : index
    %3 = vector.load %arg4[%c0_5, %c0_6] : memref<16x384xf32, #tpu.memory_space<vmem>>, vector<16x384xf32>
    %cst = arith.constant dense<0.000000e+00> : vector<128x384xf32>
    %4 = tpu.matmul %1, %3, %cst {dimension_numbers = #tpu.dot_dimension_numbers<[1], [0], [0], [1], [0, 0, 1, 1], [], []>} : vector<128x16xf32>, vector<16x384xf32>, vector<128x384xf32> -> vector<128x384xf32>
    %c0_7 = arith.constant 0 : index
    %c0_8 = arith.constant 0 : index
    %5 = vector.load %arg5[%c0_7, %c0_8] : memref<1x384xf32, #tpu.memory_space<vmem>>, vector<1x384xf32>
    %6 = vector.broadcast %5 : vector<1x384xf32> to vector<128x384xf32>
    %7 = arith.addf %4, %6 : vector<128x384xf32>
    %c0_9 = arith.constant 0 : index
    %c0_10 = arith.constant 0 : index
    %8 = vector.load %arg6[%c0_9, %c0_10] : memref<128x256xf32, #tpu.memory_space<vmem>>, vector<128x256xf32>
    %c0_11 = arith.constant 0 : index
    %c0_12 = arith.constant 0 : index
    %9 = vector.load %arg7[%c0_11, %c0_12] : memref<128x128xf32, #tpu.memory_space<vmem>>, vector<128x128xf32>
    %10 = vector.extract_strided_slice %7 {offsets = [0, 0], sizes = [128, 128], strides = [1, 1]} : vector<128x384xf32> to vector<128x128xf32>
    %11 = vector.extract_strided_slice %7 {offsets = [0, 128], sizes = [128, 128], strides = [1, 1]} : vector<128x384xf32> to vector<128x128xf32>
    %12 = vector.extract_strided_slice %7 {offsets = [0, 256], sizes = [128, 128], strides = [1, 1]} : vector<128x384xf32> to vector<128x128xf32>
    %cst_13 = arith.constant dense<0.000000e+00> : vector<128x256xf32>
    %13 = tpu.matmul %2, %8, %cst_13 {dimension_numbers = #tpu.dot_dimension_numbers<[1], [0], [0], [1], [0, 0, 1, 1], [], []>} : vector<128x128xf32>, vector<128x256xf32>, vector<128x256xf32> -> vector<128x256xf32>
    %14 = vector.extract_strided_slice %13 {offsets = [0, 0], sizes = [128, 128], strides = [1, 1]} : vector<128x256xf32> to vector<128x128xf32>
    %15 = arith.addf %10, %14 : vector<128x128xf32>
    %cst_14 = arith.constant 5.000000e-01 : f32
    %16 = vector.broadcast %cst_14 : f32 to vector<128x128xf32>
    %17 = arith.mulf %16, %15 : vector<128x128xf32>
    %18 = math.tanh %17 : vector<128x128xf32>
    %cst_15 = arith.constant 1.000000e+00 : f32
    %19 = vector.broadcast %cst_15 : f32 to vector<128x128xf32>
    %20 = arith.addf %19, %18 : vector<128x128xf32>
    %cst_16 = arith.constant 5.000000e-01 : f32
    %21 = vector.broadcast %cst_16 : f32 to vector<128x128xf32>
    %22 = arith.mulf %21, %20 : vector<128x128xf32>
    %23 = vector.extract_strided_slice %13 {offsets = [0, 128], sizes = [128, 128], strides = [1, 1]} : vector<128x256xf32> to vector<128x128xf32>
    %24 = arith.addf %11, %23 : vector<128x128xf32>
    %cst_17 = arith.constant 5.000000e-01 : f32
    %25 = vector.broadcast %cst_17 : f32 to vector<128x128xf32>
    %26 = arith.mulf %25, %24 : vector<128x128xf32>
    %27 = math.tanh %26 : vector<128x128xf32>
    %cst_18 = arith.constant 1.000000e+00 : f32
    %28 = vector.broadcast %cst_18 : f32 to vector<128x128xf32>
    %29 = arith.addf %28, %27 : vector<128x128xf32>
    %cst_19 = arith.constant 5.000000e-01 : f32
    %30 = vector.broadcast %cst_19 : f32 to vector<128x128xf32>
    %31 = arith.mulf %30, %29 : vector<128x128xf32>
    %32 = arith.mulf %22, %2 : vector<128x128xf32>
    %cst_20 = arith.constant dense<0.000000e+00> : vector<128x128xf32>
    %33 = tpu.matmul %32, %9, %cst_20 {dimension_numbers = #tpu.dot_dimension_numbers<[1], [0], [0], [1], [0, 0, 1, 1], [], []>} : vector<128x128xf32>, vector<128x128xf32>, vector<128x128xf32> -> vector<128x128xf32>
    %34 = arith.addf %12, %33 : vector<128x128xf32>
    %35 = math.tanh %34 : vector<128x128xf32>
    %cst_21 = arith.constant 1.000000e+00 : f32
    %36 = vector.broadcast %cst_21 : f32 to vector<128x128xf32>
    %37 = arith.subf %36, %31 : vector<128x128xf32>
    %38 = vector.broadcast %0 : f32 to vector<128x128xf32>
    %39 = arith.mulf %38, %37 : vector<128x128xf32>
    %40 = arith.subf %35, %2 : vector<128x128xf32>
    %41 = arith.mulf %39, %40 : vector<128x128xf32>
    %42 = arith.addf %2, %41 : vector<128x128xf32>
    %c0_22 = arith.constant 0 : index
    %c0_23 = arith.constant 0 : index
    %43 = vector.load %arg8[%c0_22, %c0_23] : memref<128x128xf32, #tpu.memory_space<vmem>>, vector<128x128xf32>
    tpu.vector_store %arg8[%c0_22, %c0_23], %42 {strides = array<i32>} : memref<128x128xf32, #tpu.memory_space<vmem>>, vector<128x128xf32>,
    return
  }
  func.func @transform_0(%arg0: i32) -> (i32, i32) {
    %c0_i32 = arith.constant 0 : i32
    %c0_i32_0 = arith.constant 0 : i32
    %c0_i32_1 = arith.constant 0 : i32
    return %c0_i32, %c0_i32_0 : i32, i32
  }
  func.func @transform_1(%arg0: i32) -> (i32, i32) {
    %c0_i32 = arith.constant 0 : i32
    %c0_i32_0 = arith.constant 0 : i32
    return %arg0, %c0_i32 : i32, i32
  }
  func.func @transform_2(%arg0: i32) -> (i32, i32) {
    %c0_i32 = arith.constant 0 : i32
    %c0_i32_0 = arith.constant 0 : i32
    return %arg0, %c0_i32 : i32, i32
  }
  func.func @transform_3(%arg0: i32) -> (i32, i32) {
    %c0_i32 = arith.constant 0 : i32
    %c0_i32_0 = arith.constant 0 : i32
    %c0_i32_1 = arith.constant 0 : i32
    return %c0_i32, %c0_i32_0 : i32, i32
  }
  func.func @transform_4(%arg0: i32) -> (i32, i32) {
    %c0_i32 = arith.constant 0 : i32
    %c0_i32_0 = arith.constant 0 : i32
    %c0_i32_1 = arith.constant 0 : i32
    return %c0_i32, %c0_i32_0 : i32, i32
  }
  func.func @transform_5(%arg0: i32) -> (i32, i32) {
    %c0_i32 = arith.constant 0 : i32
    %c0_i32_0 = arith.constant 0 : i32
    %c0_i32_1 = arith.constant 0 : i32
    return %c0_i32, %c0_i32_0 : i32, i32
  }
  func.func @transform_6(%arg0: i32) -> (i32, i32) {
    %c0_i32 = arith.constant 0 : i32
    %c0_i32_0 = arith.constant 0 : i32
    %c0_i32_1 = arith.constant 0 : i32
    return %c0_i32, %c0_i32_0 : i32, i32
  }
  func.func @transform_7(%arg0: i32) -> (i32, i32) {
    %c0_i32 = arith.constant 0 : i32
    %c0_i32_0 = arith.constant 0 : i32
    return %arg0, %c0_i32 : i32, i32
  }
}

</mosaic_0001>

<bundles_post_ra>
// kernel: tpu_custom_call.1
= control target key start
LH: loop header
LB: loop body
LE: loop exit
PB: predicated region body
PF: predicated region fallthrough
CT: control target
= control target key end

     0   :  { %s2727_s0 = inlined_call_operand.<no memory space> [shape: f32[1,1], index: 0, kind: input, shape index: {}]   ;;  %s2728_s1 = inlined_call_operand.vmem [shape: f32[256,16], index: 1, kind: input, shape index: {}]   ;;  %s2729_s2 = inlined_call_operand.vmem [shape: f32[256,128], index: 2, kind: input, shape index: {}]   ;;  %s2730_s3 = inlined_call_operand.hbm [shape: f32[16,384], index: 3, kind: input, shape index: {}]   ;;  %s2731_s4 = inlined_call_operand.vmem [shape: f32[1,384], index: 4, kind: input, shape index: {}]   ;;  %s2732_s5 = inlined_call_operand.hbm [shape: f32[128,256], index: 5, kind: input, shape index: {}]   ;;  %s2733_s6 = inlined_call_operand.hbm [shape: f32[128,128], index: 6, kind: input, shape index: {}]   ;;  %s2734_s7 = inlined_call_operand.hbm [shape: f32[256,128], index: 7, kind: output, shape index: {}]  }
   0x1   :  { %12 = sst [smem:[#allocation2]] %s2727_s0 }
   0x2   :  { %13 = vsyncpa [#allocation4], 0 }
   0x3   :  { %14 = vsyncpa [#allocation7], 0 }
   0x4   :  { %15 = vsyncpa [#allocation5], 0 }
   0x5   :  { %17 = vsyncpa [#allocation5 + $0x1], 0  ;;  %s2112_s26 = smov 0   ;;  %s2114_s27 = smov 0  }
   0x6   :  { %s2116_s28 = smov 0   ;;  %s2118_s29 = smov 0  }
   0x7 LB: > { %s2133_s0 = sadd.s32 4294967295, %s2054_s29   ;;  %s1536_s30 = sadd.s32 4294967294, %s2054_s29   ;;  %s2054_s29 = sphi %s2118_s29, %s2762_s29   ;;  %s2050_s28 = sphi %s2116_s28, %s2761_s28   ;;  %s2046_s27 = sphi %s2114_s27, %s2760_s27   ;;  %s2042_s26 = sphi %s2112_s26, %s2759_s26  }
   0x8   : > { %s2137_s8 = sadd.s32 1, %s2054_s29   ;;  %s187_s9 = sadd.s32 1, %s2050_s28 }
   0x9   : > { %s184_s10 = ssub.s32 %s2054_s29, %s2137_s8  ;;  %p197_p0 = scmp.ne.s32.totalorder %s2050_s28, %s2046_s27 }
   0xa   : > { %p185_p1 = scmp.eq.s32.totalorder %s184_s10, 0  ;;  %p198_p2 = scmp.eq.s32.totalorder %s2133_s0, 1 }
   0xb   : > { %p203_p3 = scmp.ne.s32.totalorder %s2046_s27, %s2042_s26  ;;  %p204_p4 = scmp.eq.s32.totalorder %s1536_s30, 1 }
   0xc   : > { %s2148_s11 = scalar_select %p185_p1, %s2050_s28, %s187_s9  }
   0xd   : > { %p2150_p5 = por %p198_p2, %p197_p0  ;;  %p2154_p6 = por %p204_p4, %p203_p3 }
   0xe   : > { %p1537_p7 = scmp.ge.s32.totalorder %s2054_s29, 1  ;;  %p211_p8 = scmp.lt.s32.totalorder %s2054_s29, 3 }
   0xf   : > { %s2737_s13 = scalar_select %p2154_p6, 1, 0 }
  0x10   : > { %p2735_p9 = scmp.eq.s32.totalorder %s2133_s0, 0  ;;  %p2161_p10 = pnand %p1537_p7, %p211_p8 }
  0x11   : > { %s2056_s15 = smov [#allocation6]   ;;  %s2057_s18 = smov [#allocation3]  }
  0x12   : > { %s242_s16 = sshll.u32 %s2056_s15, 4  ;;  %p1737_p11 = pneg %p2161_p10  ;;  %s243_s16 = int_to_ptr.vmem [resolvable:$true] %s242_s16 }
  0x13   : > { %s226_s19 = sshll.u32 %s2057_s18, 4  ;;  %s1919_s20 = scalar_lea.vmem %s243_s16, 4096  ;;  %s227_s19 = int_to_ptr.vmem [resolvable:$true] %s226_s19 }
  0x14   : > { %p2169_p12 = pnand %p2735_p9, %p1737_p11  ;;  %p1920_p0 = scmp.ne.s32.totalorder %s243_s16, %s1919_s20 }
  0x15   : > { %p1927_p3 = scmp.lt.s32.totalorder %s243_s16, %s243_s16  ;;  %p1928_p4 = scmp.lt.s32.totalorder %s1919_s20, %s1919_s20 }
  0x16   : > { %p1910_p13 = pneg %p2169_p12 }
  0x17   : > { %p1929_p7 = por %p1928_p4, %p1927_p3 }
  0x18   : > { %p1922_p1 = pnand %p1920_p0, %p1910_p13 }
  0x1a   : > { %p1923_p2 = pneg %p1922_p1 }
  0x1c   : > { %p1930_p8 = pnand %p1929_p7, %p1923_p2 }
  0x1e   : > { %1933 = shalt.err (!%p1930_p8)
}
  0x1f   : > { %s2058_s21 = smov 256   ;;  %s2059_s22 = smov 16  }
  0x20   : > { %1743 = dma.hbm_to_vmem [thread:$0]  (!%p2169_p12), %s2732_s5, 4096, %s243_s16, [#allocation7], %s2058_s21, %s2058_s21, %s2059_s22  }
  0x21   : > { %s1945_s25 = scalar_lea.vmem %s227_s19, 768  ;;  %p1953_p9 = scmp.lt.s32.totalorder %s227_s19, %s227_s19 }
  0x22   : > { %p1946_p11 = scmp.ne.s32.totalorder %s227_s19, %s1945_s25  ;;  %p1954_p6 = scmp.lt.s32.totalorder %s1945_s25, %s1945_s25 }
  0x24   : > { %p1948_p0 = pnand %p1946_p11, %p1910_p13  ;;  %p1955_p3 = por %p1954_p6, %p1953_p9 }
  0x26   : > { %p1949_p1 = pneg %p1948_p0 }
  0x28   : > { %p1956_p2 = pnand %p1955_p3, %p1949_p1 }
  0x2a   : > { %1959 = shalt.err (!%p1956_p2)
}
  0x2b   : > { %s2060_s30 = smov 384   ;;  %s2061_s9 = smov 24  }
  0x2c   : > { %1740 = dma.hbm_to_vmem [thread:$0]  (!%p2169_p12), %s2730_s3, 768, %s227_s19, [#allocation4], %s2060_s30, %s2060_s30, %s2061_s9  }
  0x2d   : > { %s2062_s16 = smov [#allocation8]  }
  0x2e   : > { %s255_s18 = sshll.u32 %s2062_s16, 4  ;;  %s256_s18 = int_to_ptr.vmem [resolvable:$true] %s255_s18 }
  0x2f   : > { %s1971_s20 = scalar_lea.vmem %s256_s18, 2048  ;;  %p1979_p9 = scmp.lt.s32.totalorder %s256_s18, %s256_s18 }
  0x30   : > { %p1972_p4 = scmp.ne.s32.totalorder %s256_s18, %s1971_s20  ;;  %p1980_p8 = scmp.lt.s32.totalorder %s1971_s20, %s1971_s20 }
  0x32   : > { %p1974_p7 = pnand %p1972_p4, %p1910_p13  ;;  %p1981_p11 = por %p1980_p8, %p1979_p9 }
  0x34   : > { %p1975_p6 = pneg %p1974_p7 }
  0x36   : > { %p1982_p0 = pnand %p1981_p11, %p1975_p6 }
  0x38   : > { %1985 = shalt.err (!%p1982_p0)
}
  0x39   : > { %s2063_s21 = smov 128   ;;  %s2064_s22 = smov 8  }
  0x3a   : > { %1746 = dma.hbm_to_vmem [thread:$0]  (!%p2169_p12), %s2733_s6, 2048, %s256_s18, [#allocation7], %s2063_s21, %s2063_s21, %s2064_s22  }
  0x3b   : > { %289 = sbr.rel (%p2161_p10) target bundleno = 618 (0x26a), region = 48 }
  0x40   : > { %p2740_p1 = scmp.eq.s32.totalorder %s2133_s0, 0 }
  0x42   : > { %2029 = dma.done.wait (%p2740_p1), [#allocation4], 768   ;;  %p2741_p13 = pmov %p2740_p1 }
  0x43   : > { %p2742_p3 = pmov %p2740_p1 }
  0x44   : > { %2031 = vsyncadd (%p2741_p13), [#allocation4], 4294966528 }
  0x45   : > { %2033 = dma.done.wait (%p2742_p3), [#allocation7], 6144   ;;  %p2743_p2 = pmov %p2740_p1 }
  0x46   : > { %s1547_s17 = sshll.u32 %s2133_s0, 4  ;;  %v2065_v0 = vmov 0.0   ;;  %vm403_vm0 = vcmask 130048   ;;  %v385_v1 = vld [vmem:[#allocation3 + $0x28] sm:$0xff]  ;;  %v382_v2 = vld [vmem:[#allocation3 + $0x10] sm:$0xff]  ;;  %v788_v6 = vld [vmem:[#allocation6 + $0xf0] sm:$0xff] }
  0x47   : > { %2035 = vsyncadd (%p2743_p2), [#allocation7], 4294961152  ;;  %p335_p4 = scmp.lt.s32.totalorder %s1547_s17, 31  ;;  %516 = vmatprep.mubr.f32.mxu0 %v2065_v0  ;;  %1639 = vmatprep.subr.mxu1 %v385_v1  ;;  %v789_v5 = vld [vmem:[#allocation6 + $0xf8] sm:$0xff]  ;;  %v787_v8 = vld [vmem:[#allocation6 + $0xe8] sm:$0xff]  ;;  %s347_s20 = sld [smem:[#allocation2]] }
  0x48   : > { %1640 = vmatpush3.msra.mxu1 %v385_v1  ;;  %v786_v9 = vld [vmem:[#allocation6 + $0xe0] sm:$0xff]  ;;  %v785_v11 = vld [vmem:[#allocation6 + $0xd8] sm:$0xff]  ;;  %v784_v12 = vld [vmem:[#allocation6 + $0xd0] sm:$0xff]  ;;  %s331_s21 = sand.u32 1, %s2046_s27   ;;  %s1588_s19 = sshll.u32 %s2133_s0, 11 }
  0x49   : > { %s2764_s17 = smov (!%p335_p4, %s1547_s17), 31  ;;  %1641 = vmatprep.subr.mxu1 %v382_v2  ;;  %v783_v14 = vld [vmem:[#allocation6 + $0xc8] sm:$0xff]  ;;  %v782_v15 = vld [vmem:[#allocation6 + $0xc0] sm:$0xff]  ;;  %v781_v17 = vld [vmem:[#allocation6 + $0xb8] sm:$0xff]  ;;  %s1546_s22 = sshll.u32 %s331_s21, 7 }
  0x4a   : > { %s1548_s14 = sshll.u32 %s2764_s17, 3  ;;  %1642 = vmatpush3.msra.mxu1 %v382_v2  ;;  %v780_v18 = vld [vmem:[#allocation6 + $0xb0] sm:$0xff]  ;;  %v779_v20 = vld [vmem:[#allocation6 + $0xa8] sm:$0xff]  ;;  %v778_v21 = vld [vmem:[#allocation6 + $0xa0] sm:$0xff]  ;;  %s2599_s23 = scalar_lea.vmem [#allocation9], %s1546_s22 }
  0x4b   : > { %s2219_s30 = scalar_lea.vmem %s2728_s1, %s1548_s14  ;;  %806 = vmatprep.subr.mxu1 %v789_v5  ;;  %v384_v22 = vld [vmem:[#allocation3 + $0x20] sm:$0xff]  ;;  %v777_v24 = vld [vmem:[#allocation6 + $0x98] sm:$0xff]  ;;  %v383_v25 = vld [vmem:[#allocation3 + $0x18] sm:$0xff]  ;;  %s2310_s15 = scalar_lea.vmem %s2729_s2, %s1548_s14 }
  0x4c   : > { %v2222_v3 = vld [vmem:[%s2219_s30] sm:$0xff]  ;;  %v2227_v4 = vld [vmem:[%s2219_s30 + $0x8] sm:$0xff]  ;;  %v2230_v7 = vld [vmem:[%s2219_s30 + $0x10] sm:$0xff]  ;;  %480 = vmatprep.subr.mxu0 %v384_v22  ;;  %s1431_s17 = sshll.u32 %s2599_s23, 4  ;;  %s2679_s25 = scalar_lea.hbm %s2734_s7, %s1588_s19  ;;  %s2681_s17 = int_to_ptr.vmem [resolvable:$true] %s1431_s17 }
  0x4d   : > { %1643 = vmatprep.mubr.msk.f32.mxu1 %vm403_vm0, %v2222_v3  ;;  %v2237_v10 = vld [vmem:[%s2219_s30 + $0x18] sm:$0xff]  ;;  %v2240_v13 = vld [vmem:[%s2219_s30 + $0x20] sm:$0xff]  ;;  %v2247_v16 = vld [vmem:[%s2219_s30 + $0x28] sm:$0xff]  ;;  %481 = vmatpush1.msra.mxu0 %v383_v25  ;;  %s1986_s0 = scalar_lea.vmem %s2681_s17, 2048  ;;  %s2066_s9 = smov [#allocation9]  }
  0x4e   : > { %1644 = vmatmul.mubr.msk.f32.vlgmr.msra.gmra.mxu1 %vm403_vm0, %v2227_v4  ;;  %v2250_v19 = vld [vmem:[%s2219_s30 + $0x30] sm:$0xff]  ;;  %v2257_v23 = vld [vmem:[%s2219_s30 + $0x38] sm:$0xff]  ;;  %v776_v26 = vld [vmem:[#allocation6 + $0x90] sm:$0xff]  ;;  %p1987_p10 = scmp.ne.s32.totalorder %s2681_s17, %s1986_s0  ;;  %s1990_s10 = sshll.u32 %s2066_s9, 4  ;;  %s1991_s10 = int_to_ptr.vmem [resolvable:$false] %s1990_s10 }
  0x4f   : > { %807 = vmatpush1.msra.mxu1 %v788_v6  ;;  %1646 = vmatprep.mubr.msk.f32.mxu1 %vm403_vm0, %v2230_v7  ;;  %v2260_v27 = vld [vmem:[%s2219_s30 + $0x40] sm:$0xff]  ;;  %v775_v28 = vld [vmem:[#allocation6 + $0x88] sm:$0xff]  ;;  %v381_v29 = vld [vmem:[#allocation3 + $0x8] sm:$0xff]  ;;  %p1993_p6 = scmp.lt.s32.totalorder %s2681_s17, %s1991_s10 }
  0x50   : > { %808 = vmatprep.subr.mxu1 %v787_v8  ;;  %v774_v30 = vld [vmem:[#allocation6 + $0x80] sm:$0xff]  ;;  %v380_v31 = vld [vmem:[#allocation3] sm:$0xff]  ;;  %v2267_v32 = vld [vmem:[%s2219_s30 + $0x48] sm:$0xff]  ;;  %482 = vmatprep.subr.mxu0 %v381_v29  ;;  %p1988_p12 = pnand %p1987_p10, %p2150_p5 }
  0x51   : > { %809 = vmatpush1.msra.mxu1 %v786_v9  ;;  %v773_v33 = vld [vmem:[#allocation6 + $0x78] sm:$0xff]  ;;  %v772_v34 = vld [vmem:[#allocation6 + $0x70] sm:$0xff]  ;;  %v2270_v35 = vld [vmem:[%s2219_s30 + $0x50] sm:$0xff]  ;;  %483 = vmatpush1.msra.mxu0 %v380_v31  ;;  %v388_v31 = vlaneseq }
  0x52   : > { %1647 = vmatmul.mubr.msk.f32.gmra.mxu1 %vm403_vm0, %v2237_v10  ;;  %810 = vmatprep.subr.mxu1 %v785_v11  ;;  %v771_v36 = vld [vmem:[#allocation6 + $0x68] sm:$0xff]  ;;  %v770_v37 = vld [vmem:[#allocation6 + $0x60] sm:$0xff]  ;;  %v769_v39 = vld [vmem:[#allocation6 + $0x58] sm:$0xff]  ;;  %p1989_p7 = pneg %p1988_p12 }
  0x53   : > { %811 = vmatpush1.msra.mxu1 %v784_v12  ;;  %1649 = vmatprep.mubr.msk.f32.mxu1 %vm403_vm0, %v2240_v13  ;;  %v2277_v38 = vld [vmem:[%s2219_s30 + $0x58] sm:$0xff]  ;;  %v768_v40 = vld [vmem:[#allocation6 + $0x50] sm:$0xff]  ;;  %v766_v43 = vld [vmem:[#allocation6 + $0x40] sm:$0xff] }
  0x54   : > { %812 = vmatprep.subr.mxu1 %v783_v14  ;;  %v2280_v41 = vld [vmem:[%s2219_s30 + $0x60] sm:$0xff]  ;;  %1551 = vmatmul.mubr.msk.f32.vlgmr.msra.gmra.mxu0 %vm403_vm0, %v2222_v3  ;;  %v767_v42 = vld [vmem:[#allocation6 + $0x48] sm:$0xff]  ;;  %v2290_v44 = vld [vmem:[%s2219_s30 + $0x68] sm:$0xff] }
  0x55   : > { %813 = vmatpush1.msra.mxu1 %v782_v15  ;;  %522 = vmatprep.mubr.f32.mxu0 %v2065_v0  ;;  %v765_v45 = vld [vmem:[#allocation6 + $0x38] sm:$0xff]  ;;  %v764_v46 = vld [vmem:[#allocation6 + $0x30] sm:$0xff]  ;;  %v2293_v47 = vld [vmem:[%s2219_s30 + $0x70] sm:$0xff] }
  0x56   : > { %1650 = vmatmul.mubr.msk.f32.gmra.mxu1 %vm403_vm0, %v2247_v16  ;;  %814 = vmatprep.subr.mxu1 %v781_v17  ;;  %v763_v48 = vld [vmem:[#allocation6 + $0x28] sm:$0xff]  ;;  %v762_v49 = vld [vmem:[#allocation6 + $0x20] sm:$0xff]  ;;  %v761_v51 = vld [vmem:[#allocation6 + $0x18] sm:$0xff] }
  0x57   : > { %815 = vmatpush1.msra.mxu1 %v780_v18  ;;  %1652 = vmatprep.mubr.msk.f32.mxu1 %vm403_vm0, %v2250_v19  ;;  %v2303_v50 = vld [vmem:[%s2219_s30 + $0x78] sm:$0xff]  ;;  %v760_v52 = vld [vmem:[#allocation6 + $0x10] sm:$0xff]  ;;  %v758_v54 = vld [vmem:[#allocation6] sm:$0xff]  ;;  %s2687_s30 = scalar_lea.sflag [#allocation5], %s331_s21 }
  0x58   : > { %816 = vmatprep.subr.mxu1 %v779_v20  ;;  %1552 = vmatmul.mubr.msk.f32.gmra.mxu0 %vm403_vm0, %v2227_v4  ;;  %v759_v53 = vld [vmem:[#allocation6 + $0x8] sm:$0xff]  ;;  %v2319_v55 = vld [vmem:[%s2310_s15] sm:$0xff]  ;;  %v2327_v56 = vld [vmem:[%s2310_s15 + $0x8] sm:$0xff] }
  0x59   : > { %817 = vmatpush1.msra.mxu1 %v778_v21  ;;  %528 = vmatprep.mubr.f32.mxu0 %v2065_v0  ;;  %v2335_v57 = vld [vmem:[%s2310_s15 + $0x10] sm:$0xff]  ;;  %v2343_v58 = vld [vmem:[%s2310_s15 + $0x18] sm:$0xff]  ;;  %v2351_v59 = vld [vmem:[%s2310_s15 + $0x20] sm:$0xff] }
  0x5a   : > { %1653 = vmatmul.mubr.msk.f32.gmra.mxu1 %vm403_vm0, %v2257_v23  ;;  %818 = vmatprep.subr.mxu1 %v777_v24  ;;  %v2359_v60 = vld [vmem:[%s2310_s15 + $0x28] sm:$0xff]  ;;  %v2367_v61 = vld [vmem:[%s2310_s15 + $0x30] sm:$0xff]  ;;  %v2375_v62 = vld [vmem:[%s2310_s15 + $0x38] sm:$0xff] }
  0x5b   : > { %819 = vmatpush1.msra.mxu1 %v776_v26  ;;  %1655 = vmatprep.mubr.msk.f32.mxu1 %vm403_vm0, %v2260_v27  ;;  %v2383_v63 = vld [vmem:[%s2310_s15 + $0x40] sm:$0xff]  ;;  %v2391_v1 = vld [vmem:[%s2310_s15 + $0x48] sm:$0xff]  ;;  %v2399_v2 = vld [vmem:[%s2310_s15 + $0x50] sm:$0xff] }
  0x5c   : > { %820 = vmatprep.subr.mxu1 %v775_v28  ;;  %1553 = vmatmul.mubr.msk.f32.gmra.mxu0 %vm403_vm0, %v2230_v7  ;;  %v2407_v3 = vld [vmem:[%s2310_s15 + $0x58] sm:$0xff]  ;;  %v2415_v4 = vld [vmem:[%s2310_s15 + $0x60] sm:$0xff]  ;;  %v2422_v5 = vld [vmem:[%s2310_s15 + $0x68] sm:$0xff] }
  0x5d   : > { %821 = vmatpush1.msra.mxu1 %v774_v30  ;;  %534 = vmatprep.mubr.f32.mxu0 %v2065_v0  ;;  %v2427_v6 = vld [vmem:[%s2310_s15 + $0x70] sm:$0xff]  ;;  %v2432_v7 = vld [vmem:[%s2310_s15 + $0x78] sm:$0xff]  ;;  %v805_v8 = vld [vmem:[#allocation8 + $0x78] sm:$0xff] }
  0x5e   : > { %1656 = vmatmul.mubr.msk.f32.gmra.mxu1 %vm403_vm0, %v2267_v32  ;;  %822 = vmatprep.subr.mxu1 %v773_v33  ;;  %v804_v9 = vld [vmem:[#allocation8 + $0x70] sm:$0xff]  ;;  %v802_v11 = vld [vmem:[#allocation8 + $0x60] sm:$0xff]  ;;  %v801_v12 = vld [vmem:[#allocation8 + $0x58] sm:$0xff] }
  0x5f   : > { %823 = vmatpush1.msra.mxu1 %v772_v34  ;;  %1658 = vmatprep.mubr.msk.f32.mxu1 %vm403_vm0, %v2270_v35  ;;  %v798_v14 = vld [vmem:[#allocation8 + $0x40] sm:$0xff]  ;;  %v797_v15 = vld [vmem:[#allocation8 + $0x38] sm:$0xff]  ;;  %v795_v17 = vld [vmem:[#allocation8 + $0x28] sm:$0xff] }
  0x60   : > { %824 = vmatprep.subr.mxu1 %v771_v36  ;;  %1554 = vmatmul.mubr.msk.f32.gmra.mxu0 %vm403_vm0, %v2237_v10  ;;  %v803_v10 = vld [vmem:[#allocation8 + $0x68] sm:$0xff]  ;;  %v794_v18 = vld [vmem:[#allocation8 + $0x20] sm:$0xff]  ;;  %v792_v20 = vld [vmem:[#allocation8 + $0x10] sm:$0xff] }
  0x61   : > { %825 = vmatpush1.msra.mxu1 %v770_v37  ;;  %540 = vmatprep.mubr.f32.mxu0 %v2065_v0  ;;  %v791_v21 = vld [vmem:[#allocation8 + $0x8] sm:$0xff]  ;;  %v790_v22 = vld [vmem:[#allocation8] sm:$0xff] }
  0x62   : > { %1659 = vmatmul.mubr.msk.f32.gmra.mxu1 %vm403_vm0, %v2277_v38  ;;  %826 = vmatprep.subr.mxu1 %v769_v39 }
  0x63   : > { %827 = vmatpush1.msra.mxu1 %v768_v40  ;;  %1661 = vmatprep.mubr.msk.f32.mxu1 %vm403_vm0, %v2280_v41 }
  0x64   : > { %828 = vmatprep.subr.mxu1 %v767_v42  ;;  %1555 = vmatmul.mubr.msk.f32.gmra.mxu0 %vm403_vm0, %v2240_v13  ;;  %v799_v13 = vld [vmem:[#allocation8 + $0x48] sm:$0xff] }
  0x65   : > { %829 = vmatpush1.msra.mxu1 %v766_v43  ;;  %546 = vmatprep.mubr.f32.mxu0 %v2065_v0 }
  0x66   : > { %1662 = vmatmul.mubr.msk.f32.gmra.mxu1 %vm403_vm0, %v2290_v44  ;;  %830 = vmatprep.subr.mxu1 %v765_v45 }
  0x67   : > { %831 = vmatpush1.msra.mxu1 %v764_v46  ;;  %1664 = vmatprep.mubr.msk.f32.mxu1 %vm403_vm0, %v2293_v47 }
  0x68   : > { %832 = vmatprep.subr.mxu1 %v763_v48  ;;  %1556 = vmatmul.mubr.msk.f32.gmra.mxu0 %vm403_vm0, %v2247_v16  ;;  %v796_v16 = vld [vmem:[#allocation8 + $0x30] sm:$0xff] }
  0x69   : > { %833 = vmatpush1.msra.mxu1 %v762_v49  ;;  %552 = vmatprep.mubr.f32.mxu0 %v2065_v0 }
  0x6a   : > { %1665 = vmatmul.mubr.msk.f32.gmra.mxu1 %vm403_vm0, %v2303_v50  ;;  %834 = vmatprep.subr.mxu1 %v761_v51 }
  0x6b   : > { %835 = vmatpush1.msra.mxu1 %v760_v52  ;;  %870 = vmatprep.mubr.f32.mxu1 %v2065_v0 }
  0x6c   : > { %836 = vmatprep.subr.mxu1 %v759_v53  ;;  %1557 = vmatmul.mubr.msk.f32.gmra.mxu0 %vm403_vm0, %v2250_v19  ;;  %v793_v19 = vld [vmem:[#allocation8 + $0x18] sm:$0xff] }
  0x6d   : > { %837 = vmatpush1.msra.mxu1 %v758_v54  ;;  %558 = vmatprep.mubr.f32.mxu0 %v2065_v0 }
  0x6e   : > { %871 = vmatmul.mubr.f32.vlgmr.msra.gmra.mxu1 %v2319_v55  ;;  %1667 = vmatprep.subr.mxu0 %v805_v8 }
  0x6f   : > { %876 = vmatprep.mubr.f32.mxu1 %v2065_v0  ;;  %1668 = vmatpush3.msra.mxu0 %v805_v8 }
  0x70   : > { %1558 = vmatmul.mubr.msk.f32.gmra.mxu0 %vm403_vm0, %v2257_v23  ;;  %1669 = vmatprep.subr.mxu0 %v804_v9 }
  0x71   : > { %564 = vmatprep.mubr.f32.mxu0 %v2065_v0  ;;  %1670 = vmatpush3.msra.mxu0 %v804_v9 }
  0x72   : > { %877 = vmatmul.mubr.f32.gmra.mxu1 %v2327_v56  ;;  %1671 = vmatprep.subr.mxu0 %v803_v10 }
  0x73   : > { %882 = vmatprep.mubr.f32.mxu1 %v2065_v0  ;;  %1672 = vmatpush3.msra.mxu0 %v803_v10 }
  0x74   : > { %1559 = vmatmul.mubr.msk.f32.gmra.mxu0 %vm403_vm0, %v2260_v27  ;;  %1673 = vmatprep.subr.mxu0 %v802_v11 }
  0x75   : > { %570 = vmatprep.mubr.f32.mxu0 %v2065_v0  ;;  %1674 = vmatpush3.msra.mxu0 %v802_v11 }
  0x76   : > { %883 = vmatmul.mubr.f32.gmra.mxu1 %v2335_v57  ;;  %1675 = vmatprep.subr.mxu0 %v801_v12 }
  0x77   : > { %888 = vmatprep.mubr.f32.mxu1 %v2065_v0  ;;  %1676 = vmatpush3.msra.mxu0 %v801_v12 }
  0x78   : > { %1560 = vmatmul.mubr.msk.f32.gmra.mxu0 %vm403_vm0, %v2267_v32 }
  0x79   : > { %576 = vmatprep.mubr.f32.mxu0 %v2065_v0 }
  0x7a   : > { %889 = vmatmul.mubr.f32.gmra.mxu1 %v2343_v58 }
  0x7b   : > { %894 = vmatprep.mubr.f32.mxu1 %v2065_v0 }
  0x7c   : > { %1561 = vmatmul.mubr.msk.f32.gmra.mxu0 %vm403_vm0, %v2270_v35  ;;  %v2455_v35 = vshrl.u32 %v388_v31, 7 }
  0x7d   : > { %582 = vmatprep.mubr.f32.mxu0 %v2065_v0 }
  0x7e   : > { %895 = vmatmul.mubr.f32.gmra.mxu1 %v2351_v59  ;;  %v394_v45 = vsub.s32 1, %v2455_v35 }
  0x7f   : > { %900 = vmatprep.mubr.f32.mxu1 %v2065_v0 }
  0x80   : > { %1562 = vmatmul.mubr.msk.f32.gmra.mxu0 %vm403_vm0, %v2277_v38  ;;  %v390_v38 = vsub.s32 0, %v2455_v35 }
  0x81   : > { %588 = vmatprep.mubr.f32.mxu0 %v2065_v0 }
  0x82   : > { %901 = vmatmul.mubr.f32.gmra.mxu1 %v2359_v60 }
  0x83   : > { %906 = vmatprep.mubr.f32.mxu1 %v2065_v0 }
  0x84   : > { %1563 = vmatmul.mubr.msk.f32.gmra.mxu0 %vm403_vm0, %v2280_v41  ;;  %v2465_v41 = vld [vmem:[%s2731_s4] sm:$0x7] }
  0x85   : > { %594 = vmatprep.mubr.f32.mxu0 %v2065_v0  ;;  %v2479_v51 = vrot.slane %v2465_v41, %v394_v45 }
  0x86   : > { %907 = vmatmul.mubr.f32.gmra.mxu1 %v2367_v61 }
  0x87   : > { %912 = vmatprep.mubr.f32.mxu1 %v2065_v0 }
  0x88   : > { %1564 = vmatmul.mubr.msk.f32.gmra.mxu0 %vm403_vm0, %v2290_v44  ;;  %v2470_v44 = vrot.slane %v2465_v41, %v390_v38 }
  0x89   : > { %600 = vmatprep.mubr.f32.mxu0 %v2065_v0 }
  0x8a   : > { %913 = vmatmul.mubr.f32.gmra.mxu1 %v2375_v62 }
  0x8b   : > { %918 = vmatprep.mubr.f32.mxu1 %v2065_v0 }
  0x8c   : > { %1565 = vmatmul.mubr.msk.f32.gmra.mxu0 %vm403_vm0, %v2293_v47 }
  0x8d   : > { %606 = vmatprep.mubr.f32.mxu0 %v2065_v0 }
  0x8e   : > { %919 = vmatmul.mubr.f32.gmra.mxu1 %v2383_v63 }
  0x8f   : > { %924 = vmatprep.mubr.f32.mxu1 %v2065_v0 }
  0x90   : > { %1566 = vmatmul.mubr.msk.f32.gmra.mxu0 %vm403_vm0, %v2303_v50 }
  0x92   : > { %925 = vmatmul.mubr.f32.gmra.mxu1 %v2391_v1 }
  0x93   : > { %930 = vmatprep.mubr.f32.mxu1 %v2065_v0 }
  0x96   : > { %931 = vmatmul.mubr.f32.gmra.mxu1 %v2399_v2 }
  0x97   : > { %936 = vmatprep.mubr.f32.mxu1 %v2065_v0 }
  0x9a   : > { %937 = vmatmul.mubr.f32.gmra.mxu1 %v2407_v3 }
  0x9b   : > { %942 = vmatprep.mubr.f32.mxu1 %v2065_v0 }
  0x9e   : > { %943 = vmatmul.mubr.f32.gmra.mxu1 %v2415_v4 }
  0x9f   : > { %948 = vmatprep.mubr.f32.mxu1 %v2065_v0 }
  0xa2   : > { %949 = vmatmul.mubr.f32.gmra.mxu1 %v2422_v5 }
  0xa3   : > { %954 = vmatprep.mubr.f32.mxu1 %v2065_v0 }
  0xa6   : > { %955 = vmatmul.mubr.f32.gmra.mxu1 %v2427_v6 }
  0xa7   : > { %960 = vmatprep.mubr.f32.mxu1 %v2065_v0  ;;  %v800_v0 = vld [vmem:[#allocation8 + $0x50] sm:$0xff] }
  0xa8   : > { %1677 = vmatprep.subr.mxu0 %v800_v0 }
  0xa9   : > { %1678 = vmatpush3.msra.mxu0 %v800_v0 }
  0xaa   : > { %961 = vmatmul.mubr.f32.gmra.mxu1 %v2432_v7  ;;  %1679 = vmatprep.subr.mxu0 %v799_v13 }
  0xab   : > { %1680 = vmatpush3.msra.mxu0 %v799_v13 }
  0xac   : > { %1681 = vmatprep.subr.mxu0 %v798_v14 }
  0xad   : > { %1682 = vmatpush3.msra.mxu0 %v798_v14 }
  0xae   : > { %1683 = vmatprep.subr.mxu0 %v797_v15 }
  0xaf   : > { %1684 = vmatpush3.msra.mxu0 %v797_v15 }
  0xb0   : > { %1685 = vmatprep.subr.mxu0 %v796_v16 }
  0xb1   : > { %1686 = vmatpush3.msra.mxu0 %v796_v16 }
  0xb2   : > { %1687 = vmatprep.subr.mxu0 %v795_v17 }
  0xb3   : > { %1688 = vmatpush3.msra.mxu0 %v795_v17 }
  0xb4   : > { %1689 = vmatprep.subr.mxu0 %v794_v18 }
  0xb5   : > { %1690 = vmatpush3.msra.mxu0 %v794_v18 }
  0xb6   : > { %1691 = vmatprep.subr.mxu0 %v793_v19 }
  0xb7   : > { %1692 = vmatpush3.msra.mxu0 %v793_v19 }
  0xb8   : > { %1693 = vmatprep.subr.mxu0 %v792_v20 }
  0xb9   : > { %1694 = vmatpush3.msra.mxu0 %v792_v20 }
  0xba   : > { %1695 = vmatprep.subr.mxu0 %v791_v21 }
  0xbb   : > { %1696 = vmatpush3.msra.mxu0 %v791_v21 }
  0xbc   : > { %1697 = vmatprep.subr.mxu0 %v790_v22 }
  0xbd   : > { %1698 = vmatpush3.msra.mxu0 %v790_v22 }
 0x10e   : > { %v2435_v23 = vpop.f32.mrf.mxu1 }
 0x110   : > { %v2437_v24 = vpop.f32.mrf.mxu1 }
 0x112   : > { %v2439_v25 = vpop.f32.mrf.mxu1 }
 0x114   : > { %v2441_v26 = vpop.f32.mrf.mxu1  ;;  %v518_v34 = vpop.f32.mrf.mxu0 }
 0x115   : > { %v519_v50 = vadd.f32 %v518_v34, %v2470_v44 }
 0x116   : > { %v2443_v27 = vpop.f32.mrf.mxu1  ;;  %v520_v37 = vpop.f32.mrf.mxu0 }
 0x117   : > { %v521_v9 = vadd.f32 %v520_v37, %v2479_v51 }
 0x118   : > { %v2445_v28 = vpop.f32.mrf.mxu1  ;;  %v524_v40 = vpop.f32.mrf.mxu0 }
 0x119   : > { %v525_v11 = vadd.f32 %v524_v40, %v2470_v44 }
 0x11a   : > { %v2447_v29 = vpop.f32.mrf.mxu1  ;;  %v526_v43 = vpop.f32.mrf.mxu0 }
 0x11b   : > { %v527_v17 = vadd.f32 %v526_v43, %v2479_v51 }
 0x11c   : > { %v2449_v30 = vpop.f32.mrf.mxu1  ;;  %v530_v47 = vpop.f32.mrf.mxu0 }
 0x11d   : > { %v531_v19 = vadd.f32 %v530_v47, %v2470_v44 }
 0x11e   : > { %v2451_v32 = vpop.f32.mrf.mxu1  ;;  %v532_v49 = vpop.f32.mrf.mxu0 }
 0x11f   : > { %v533_v38 = vadd.f32 %v532_v49, %v2479_v51 }
 0x120   : > { %v2453_v33 = vpop.f32.mrf.mxu1  ;;  %v536_v53 = vpop.f32.mrf.mxu0 }
 0x121   : > { %2744 = vst [vmem:[#allocation13_spill] sm:$0xff] %v2453_v33  ;;  %v537_v45 = vadd.f32 %v536_v53, %v2470_v44 }
 0x122   : > { %v2457_v36 = vpop.f32.mrf.mxu1  ;;  %v538_v8 = vpop.f32.mrf.mxu0 }
 0x123   : > { %2745 = vst [vmem:[#allocation14_spill] sm:$0xff] %v2457_v36 }
 0x124   : > { %v2460_v39 = vpop.f32.mrf.mxu1  ;;  %v542_v0 = vpop.f32.mrf.mxu0 }
 0x125   : > { %2746 = vst [vmem:[#allocation15_spill] sm:$0xff] %v2460_v39 }
 0x126   : > { %v2467_v42 = vpop.f32.mrf.mxu1  ;;  %v544_v16 = vpop.f32.mrf.mxu0 }
 0x127   : > { %2747 = vst [vmem:[#allocation16_spill] sm:$0xff] %v2467_v42 }
 0x128   : > { %v2473_v46 = vpop.f32.mrf.mxu1  ;;  %v548_v21 = vpop.f32.mrf.mxu0 }
 0x129   : > { %2748 = vst [vmem:[#allocation17_spill] sm:$0xff] %v2473_v46 }
 0x12a   : > { %v2475_v48 = vpop.f32.mrf.mxu1  ;;  %v550_v37 = vpop.f32.mrf.mxu0 }
 0x12b   : > { %2749 = vst [vmem:[#allocation18_spill] sm:$0xff] %v2475_v48 }
 0x12c   : > { %v2481_v52 = vpop.f32.mrf.mxu1 }
 0x12d   : > { %2750 = vst [vmem:[#allocation19_spill] sm:$0xff] %v2481_v52 }
 0x12e   : > { %v872_v54 = vpop.f32.mrf.mxu1 }
 0x12f   : > { %v967_v10 = vadd.f32 %v872_v54, %v519_v50  ;;  %v554_v54 = vpop.f32.mrf.mxu0 }
 0x130   : > { %v874_v12 = vpop.f32.mrf.mxu1 }
 0x131   : > { %v983_v13 = vmul.f32 0.5, %v967_v10  ;;  %v2485_v14 = vadd.f32 %v874_v12, %v521_v9  ;;  %v556_v47 = vpop.f32.mrf.mxu0 }
 0x132   : > { %v878_v15 = vpop.f32.mrf.mxu1 }
 0x133   : > { %1802 = vtanh.f32 %v983_v13  ;;  %v968_v18 = vadd.f32 %v878_v15, %v525_v11  ;;  %v539_v11 = vadd.f32 %v538_v8, %v2479_v51  ;;  %v543_v13 = vadd.f32 %v542_v0, %v2470_v44 }
 0x134   : > { %v880_v20 = vpop.f32.mrf.mxu1 }
 0x135   : > { %v984_v22 = vmul.f32 0.5, %v968_v18  ;;  %v2489_v31 = vadd.f32 %v880_v20, %v527_v17  ;;  %v560_v17 = vpop.f32.mrf.mxu0  ;;  %v545_v20 = vadd.f32 %v544_v16, %v2479_v51  ;;  %v555_v16 = vadd.f32 %v554_v54, %v2470_v44 }
 0x136   : > { %v884_v34 = vpop.f32.mrf.mxu1 }
 0x137   : > { %1804 = vtanh.f32 %v984_v22  ;;  %v969_v40 = vadd.f32 %v884_v34, %v531_v19  ;;  %v562_v53 = vpop.f32.mrf.mxu0 }
 0x138   : > { %v886_v50 = vpop.f32.mrf.mxu1 }
 0x139   : > { %v985_v9 = vmul.f32 0.5, %v969_v40  ;;  %v2493_v43 = vadd.f32 %v886_v50, %v533_v38  ;;  %v549_v38 = vadd.f32 %v548_v21, %v2470_v44  ;;  %v566_v50 = vpop.f32.mrf.mxu0 }
 0x13a   : > { %v890_v10 = vpop.f32.mrf.mxu1 }
 0x13b   : > { %1806 = vtanh.f32 %v985_v9  ;;  %v970_v12 = vadd.f32 %v890_v10, %v537_v45  ;;  %v568_v10 = vpop.f32.mrf.mxu0 }
 0x13c   : > { %v892_v15 = vpop.f32.mrf.mxu1 }
 0x13d   : > { %v986_v18 = vmul.f32 0.5, %v970_v12  ;;  %v2497_v49 = vadd.f32 %v892_v15, %v539_v11  ;;  %v551_v11 = vadd.f32 %v550_v37, %v2479_v51  ;;  %v557_v37 = vadd.f32 %v556_v47, %v2479_v51 }
 0x13e   : > { %v896_v19 = vpop.f32.mrf.mxu1  ;;  %v567_v47 = vadd.f32 %v566_v50, %v2470_v44 }
 0x13f   : > { %1808 = vtanh.f32 %v986_v18  ;;  %v971_v22 = vadd.f32 %v896_v19, %v543_v13  ;;  %v572_v19 = vpop.f32.mrf.mxu0 }
 0x140   : > { %v1803_v34 = vpop.eup %1802  ;;  %v898_v40 = vpop.f32.mrf.mxu1 }
 0x141   : > { %v1015_v8 = vadd.f32 1.0, %v1803_v34  ;;  %v987_v45 = vmul.f32 0.5, %v971_v22  ;;  %v2501_v9 = vadd.f32 %v898_v40, %v545_v20  ;;  %v574_v22 = vpop.f32.mrf.mxu0 }
 0x142   : > { %v902_v0 = vpop.f32.mrf.mxu1 }
 0x143   : > { %v1031_v12 = vmul.f32 0.5, %v1015_v8  ;;  %1810 = vtanh.f32 %v987_v45  ;;  %v972_v18 = vadd.f32 %v902_v0, %v549_v38  ;;  %v561_v8 = vadd.f32 %v560_v17, %v2470_v44  ;;  %v578_v54 = vpop.f32.mrf.mxu0 }
 0x144   : > { %v1805_v15 = vpop.eup %1804  ;;  %v904_v13 = vpop.f32.mrf.mxu1 }
 0x145   : > { %v1016_v52 = vadd.f32 1.0, %v1805_v15  ;;  %v2505_v21 = vadd.f32 %v904_v13, %v551_v11  ;;  %v988_v48 = vmul.f32 0.5, %v972_v18  ;;  %v1127_v20 = vmul.f32 %v1031_v12, %v2319_v55  ;;  %v580_v12 = vpop.f32.mrf.mxu0 }
 0x146   : > { %v908_v34 = vpop.f32.mrf.mxu1 }
 0x147   : > { %v1032_v40 = vmul.f32 0.5, %v1016_v52  ;;  %1812 = vtanh.f32 %v988_v48  ;;  %v973_v38 = vadd.f32 %v908_v34, %v555_v16  ;;  %1699 = vmatprep.mubr.f32.mxu0 %v1127_v20  ;;  %v563_v48 = vadd.f32 %v562_v53, %v2479_v51  ;;  %v584_v34 = vpop.f32.mrf.mxu0 }
 0x148   : > { %v1807_v45 = vpop.eup %1806  ;;  %v910_v0 = vpop.f32.mrf.mxu1  ;;  %v573_v53 = vadd.f32 %v572_v19, %v2470_v44 }
 0x149   : > { %v1128_v15 = vmul.f32 %v1032_v40, %v2327_v56  ;;  %v1017_v11 = vadd.f32 1.0, %v1807_v45  ;;  %v989_v13 = vmul.f32 0.5, %v973_v38  ;;  %v2511_v18 = vadd.f32 %v910_v0, %v557_v37  ;;  %v586_v38 = vpop.f32.mrf.mxu0 }
 0x14a   : > { %v914_v46 = vpop.f32.mrf.mxu1 }
 0x14b   : > { %v1033_v42 = vmul.f32 0.5, %v1017_v11  ;;  %v974_v52 = vadd.f32 %v914_v46, %v561_v8  ;;  %1700 = vmatmul.mubr.f32.vlgmr.msra.gmra.mxu0 %v1128_v15  ;;  %1814 = vtanh.f32 %v989_v13  ;;  %v569_v46 = vadd.f32 %v568_v10, %v2479_v51  ;;  %v590_v50 = vpop.f32.mrf.mxu0 }
 0x14c   : > { %v1809_v17 = vpop.eup %1808  ;;  %v916_v16 = vpop.f32.mrf.mxu1  ;;  %v579_v10 = vadd.f32 %v578_v54, %v2470_v44 }
 0x14d   : > { %v1018_v20 = vadd.f32 1.0, %v1809_v17  ;;  %v990_v39 = vmul.f32 0.5, %v974_v52  ;;  %v2515_v40 = vadd.f32 %v916_v16, %v563_v48  ;;  %v1129_v37 = vmul.f32 %v1033_v42, %v2335_v57  ;;  %v592_v42 = vpop.f32.mrf.mxu0 }
 0x14e   : > { %v920_v45 = vpop.f32.mrf.mxu1 }
 0x14f   : > { %v1034_v0 = vmul.f32 0.5, %v1018_v20  ;;  %1816 = vtanh.f32 %v990_v39  ;;  %v975_v15 = vadd.f32 %v920_v45, %v567_v47  ;;  %1702 = vmatprep.mubr.f32.mxu0 %v1129_v37  ;;  %v575_v39 = vadd.f32 %v574_v22, %v2479_v51 }
 0x150   : > { %v1811_v8 = vpop.eup %1810  ;;  %v922_v11 = vpop.f32.mrf.mxu1  ;;  %v585_v22 = vadd.f32 %v584_v34, %v2470_v44 }
 0x151   : > { %v1019_v13 = vadd.f32 1.0, %v1811_v8  ;;  %v2520_v17 = vadd.f32 %v922_v11, %v569_v46  ;;  %v991_v52 = vmul.f32 0.5, %v975_v15  ;;  %v1130_v16 = vmul.f32 %v1034_v0, %v2343_v58  ;;  %v596_v11 = vpop.f32.mrf.mxu0 }
 0x152   : > { %v926_v48 = vpop.f32.mrf.mxu1  ;;  %v581_v0 = vadd.f32 %v580_v12, %v2479_v51 }
 0x153   : > { %v1035_v36 = vmul.f32 0.5, %v1019_v13  ;;  %1818 = vtanh.f32 %v991_v52  ;;  %v976_v47 = vadd.f32 %v926_v48, %v573_v53  ;;  %1703 = vmatmul.mubr.f32.gmra.mxu0 %v1130_v16 }
 0x154   : > { %v928_v19 = vpop.f32.mrf.mxu1  ;;  %v1813_v20 = vpop.eup %1812 }
 0x155   : > { %v2525_v45 = vadd.f32 %v928_v19, %v575_v39  ;;  %v1020_v37 = vadd.f32 1.0, %v1813_v20  ;;  %v992_v46 = vmul.f32 0.5, %v976_v47  ;;  %v1131_v15 = vmul.f32 %v1035_v36, %v2351_v59  ;;  %v598_v19 = vpop.f32.mrf.mxu0 }
 0x156   : > { %v932_v8 = vpop.f32.mrf.mxu1  ;;  %v587_v36 = vadd.f32 %v586_v38, %v2479_v51 }
 0x157   : > { %v977_v13 = vadd.f32 %v932_v8, %v579_v10  ;;  %v1036_v33 = vmul.f32 0.5, %v1020_v37  ;;  %1820 = vtanh.f32 %v992_v46  ;;  %1705 = vmatprep.mubr.f32.mxu0 %v1131_v15  ;;  %v591_v10 = vadd.f32 %v590_v50, %v2470_v44 }
 0x158   : > { %v934_v54 = vpop.f32.mrf.mxu1  ;;  %v1815_v53 = vpop.eup %1814 }
 0x159   : > { %v993_v52 = vmul.f32 0.5, %v977_v13  ;;  %v2530_v48 = vadd.f32 %v934_v54, %v581_v0  ;;  %v1021_v16 = vadd.f32 1.0, %v1815_v53  ;;  %v1132_v47 = vmul.f32 %v1036_v33, %v2359_v60  ;;  %v602_v54 = vpop.f32.mrf.mxu0 }
 0x15a   : > { %v938_v39 = vpop.f32.mrf.mxu1  ;;  %v593_v0 = vadd.f32 %v592_v42, %v2479_v51 }
 0x15b   : > { %1822 = vtanh.f32 %v993_v52  ;;  %v978_v12 = vadd.f32 %v938_v39, %v585_v22  ;;  %v1037_v20 = vmul.f32 0.5, %v1021_v16  ;;  %1706 = vmatmul.mubr.f32.gmra.mxu0 %v1132_v47  ;;  %v597_v22 = vadd.f32 %v596_v11, %v2470_v44  ;;  %v604_v42 = vpop.f32.mrf.mxu0 }
 0x15c   : > { %v1817_v34 = vpop.eup %1816  ;;  %v940_v37 = vpop.f32.mrf.mxu1 }
 0x15d   : > { %v1022_v46 = vadd.f32 1.0, %v1817_v34  ;;  %v994_v8 = vmul.f32 0.5, %v978_v12  ;;  %v2535_v15 = vadd.f32 %v940_v37, %v587_v36  ;;  %v1133_v33 = vmul.f32 %v1037_v20, %v2367_v61 }
 0x15e   : > { %v944_v13 = vpop.f32.mrf.mxu1  ;;  %v599_v61 = vadd.f32 %v598_v19, %v2479_v51 }
 0x15f   : > { %v1038_v53 = vmul.f32 0.5, %v1022_v46  ;;  %1824 = vtanh.f32 %v994_v8  ;;  %v979_v38 = vadd.f32 %v944_v13, %v591_v10  ;;  %1708 = vmatprep.mubr.f32.mxu0 %v1133_v33  ;;  %v603_v10 = vadd.f32 %v602_v54, %v2470_v44  ;;  %v608_v33 = vpop.f32.mrf.mxu0 }
 0x160   : > { %v946_v50 = vpop.f32.mrf.mxu1  ;;  %v1819_v52 = vpop.eup %1818 }
 0x161   : > { %v995_v16 = vmul.f32 0.5, %v979_v38  ;;  %v2540_v39 = vadd.f32 %v946_v50, %v593_v0  ;;  %v1134_v47 = vmul.f32 %v1038_v53, %v2375_v62  ;;  %v1023_v36 = vadd.f32 1.0, %v1819_v52 }
 0x162   : > { %v950_v12 = vpop.f32.mrf.mxu1  ;;  %v609_v38 = vadd.f32 %v608_v33, %v2470_v44 }
 0x163   : > { %1826 = vtanh.f32 %v995_v16  ;;  %v980_v34 = vadd.f32 %v950_v12, %v597_v22  ;;  %1709 = vmatmul.mubr.f32.gmra.mxu0 %v1134_v47  ;;  %v1039_v20 = vmul.f32 0.5, %v1023_v36  ;;  %v605_v22 = vadd.f32 %v604_v42, %v2479_v51 }
 0x164   : > { %v952_v11 = vpop.f32.mrf.mxu1  ;;  %v1821_v37 = vpop.eup %1820 }
 0x165   : > { %v996_v46 = vmul.f32 0.5, %v980_v34  ;;  %v2545_v8 = vadd.f32 %v952_v11, %v599_v61  ;;  %v1024_v0 = vadd.f32 1.0, %v1821_v37  ;;  %v1135_v53 = vmul.f32 %v1039_v20, %v2383_v63 }
 0x166   : > { %v956_v13 = vpop.f32.mrf.mxu1 }
 0x167   : > { %1828 = vtanh.f32 %v996_v46  ;;  %v1040_v19 = vmul.f32 0.5, %v1024_v0  ;;  %v981_v52 = vadd.f32 %v956_v13, %v603_v10  ;;  %1711 = vmatprep.mubr.f32.mxu0 %v1135_v53 }
 0x168   : > { %v1823_v50 = vpop.eup %1822  ;;  %v958_v16 = vpop.f32.mrf.mxu1 }
 0x169   : > { %v1025_v54 = vadd.f32 1.0, %v1823_v50  ;;  %v997_v47 = vmul.f32 0.5, %v981_v52  ;;  %v2550_v36 = vadd.f32 %v958_v16, %v605_v22  ;;  %v1136_v61 = vmul.f32 %v1040_v19, %v2391_v1 }
 0x16a   : > { %v962_v12 = vpop.f32.mrf.mxu1 }
 0x16b   : > { %v1041_v34 = vmul.f32 0.5, %v1025_v54  ;;  %v982_v11 = vadd.f32 %v962_v12, %v609_v38  ;;  %1830 = vtanh.f32 %v997_v47  ;;  %1712 = vmatmul.mubr.f32.gmra.mxu0 %v1136_v61  ;;  %v1064_v12 = vmul.f32 0.5, %v2489_v31 }
 0x16c   : > { %v1825_v63 = vpop.eup %1824  ;;  %v398_v61 = vsub.s32 2, %v2455_v35 }
 0x16d   : > { %v1026_v44 = vadd.f32 1.0, %v1825_v63  ;;  %v998_v20 = vmul.f32 0.5, %v982_v11  ;;  %v1137_v37 = vmul.f32 %v1041_v34, %v2399_v2  ;;  %v2567_v11 = vpop.f32.mrf.mxu0 }
 0x16e   : > { %v2564_v34 = vrot.slane %v2465_v41, %v398_v61  ;;  %v1067_v41 = vmul.f32 0.5, %v2501_v9 }
 0x16f   : > { %v1042_v42 = vmul.f32 0.5, %v1026_v44  ;;  %1832 = vtanh.f32 %v998_v20  ;;  %1714 = vmatprep.mubr.f32.mxu0 %v1137_v37 }
 0x170   : > { %v1827_v10 = vpop.eup %1826  ;;  %1834 = vtanh.f32 %v1064_v12  ;;  %v690_v9 = vadd.f32 %v2441_v26, %v2564_v34  ;;  %v2584_v26 = vstv %s347_s20 }
 0x171   : > { %v1027_v46 = vadd.f32 1.0, %v1827_v10  ;;  %v1138_v0 = vmul.f32 %v1042_v42, %v2407_v3 }
 0x173   : > { %v1043_v13 = vmul.f32 0.5, %v1027_v46  ;;  %1715 = vmatmul.mubr.f32.gmra.mxu0 %v1138_v0 }
 0x174   : > { %v1829_v33 = vpop.eup %1828 }
 0x175   : > { %v1028_v1 = vadd.f32 1.0, %v1829_v33  ;;  %v1139_v53 = vmul.f32 %v1043_v13, %v2415_v4  ;;  %v1063_v4 = vmul.f32 0.5, %v2485_v14  ;;  %v680_v14 = vadd.f32 %v2437_v24, %v2564_v34 }
 0x176   : > { %v695_v24 = vadd.f32 %v2439_v25, %v2564_v34 }
 0x177   : > { %v1044_v38 = vmul.f32 0.5, %v1028_v1  ;;  %1717 = vmatprep.mubr.f32.mxu0 %v1139_v53  ;;  %1836 = vtanh.f32 %v1063_v4 }
 0x178   : > { %v1831_v50 = vpop.eup %1830 }
 0x179   : > { %v1140_v19 = vmul.f32 %v1044_v38, %v2422_v5  ;;  %v1029_v22 = vadd.f32 1.0, %v1831_v50  ;;  %v1066_v5 = vmul.f32 0.5, %v2497_v49  ;;  %v1068_v49 = vmul.f32 0.5, %v2505_v21 }
 0x17a   : > { %v1070_v21 = vmul.f32 0.5, %v2515_v40 }
 0x17b   : > { %1718 = vmatmul.mubr.f32.gmra.mxu0 %v1140_v19  ;;  %v1045_v52 = vmul.f32 0.5, %v1029_v22  ;;  %1838 = vtanh.f32 %v1066_v5  ;;  %v705_v19 = vadd.f32 %v2443_v27, %v2564_v34 }
 0x17c   : > { %v1833_v2 = vpop.eup %1832 }
 0x17d   : > { %v1030_v16 = vadd.f32 1.0, %v1833_v2  ;;  %v1141_v54 = vmul.f32 %v1045_v52, %v2427_v6  ;;  %v1065_v6 = vmul.f32 0.5, %v2493_v43  ;;  %v1835_v63 = vpop.eup %1834  ;;  %v1072_v52 = vmul.f32 0.5, %v2525_v45 }
 0x17e   : > { %v1096_v37 = vadd.f32 1.0, %v1835_v63 }
 0x17f   : > { %v1046_v47 = vmul.f32 0.5, %v1030_v16  ;;  %1720 = vmatprep.mubr.f32.mxu0 %v1141_v54  ;;  %1840 = vtanh.f32 %v1065_v6 }
 0x180   : > { %v1112_v10 = vmul.f32 0.5, %v1096_v37 }
 0x181   : > { %v1142_v3 = vmul.f32 %v1046_v47, %v2432_v7  ;;  %v685_v7 = vadd.f32 %v2435_v23, %v2564_v34  ;;  %v1069_v23 = vmul.f32 0.5, %v2511_v18 }
 0x182   : > { %v1321_v38 = vsub.f32 1.0, %v1112_v10 }
 0x183   : > { %1721 = vmatmul.mubr.f32.gmra.mxu0 %v1142_v3  ;;  %v700_v3 = vadd.f32 %v2445_v28, %v2564_v34 }
 0x184   : > { %v1837_v20 = vpop.eup %1836  ;;  %v1338_v2 = vmul.f32 %v2584_v26, %v1321_v38 }
 0x185   : > { %v1095_v42 = vadd.f32 1.0, %v1837_v20 }
 0x187   : > { %v1111_v33 = vmul.f32 0.5, %v1095_v42 }
 0x188   : > { %v1839_v13 = vpop.eup %1838 }
 0x189   : > { %v1098_v25 = vadd.f32 1.0, %v1839_v13  ;;  %v1320_v50 = vsub.f32 1.0, %v1111_v33 }
 0x18b   : > { %v1114_v12 = vmul.f32 0.5, %v1098_v25  ;;  %v1337_v27 = vmul.f32 %v2584_v26, %v1320_v50 }
 0x18c   : > { %v1841_v53 = vpop.eup %1840 }
 0x18d   : > { %v1097_v22 = vadd.f32 1.0, %v1841_v53  ;;  %v1323_v28 = vsub.f32 1.0, %v1114_v12 }
 0x18f   : > { %v1113_v45 = vmul.f32 0.5, %v1097_v22  ;;  %v725_v22 = vadd.f32 %v2451_v32, %v2564_v34 }
 0x191   : > { %v1322_v37 = vsub.f32 1.0, %v1113_v45 }
 0x20b   : > { %v1701_v31 = vpop.f32.mrf.mxu0 }
 0x20c   : > { %v1289_v35 = vadd.f32 %v1701_v31, %v685_v7 }
 0x20d   : > { %v1209_v44 = vpop.f32.mrf.mxu0 }
 0x20e   : > { %1842 = vtanh.f32 %v1289_v35  ;;  %v1288_v43 = vadd.f32 %v1209_v44, %v680_v14  ;;  %v1071_v14 = vmul.f32 0.5, %v2520_v17 }
 0x210   : > { %1844 = vtanh.f32 %v1288_v43 }
 0x211   : > { %1846 = vtanh.f32 %v1068_v49 }
 0x212   : > { %1848 = vtanh.f32 %v1067_v41  ;;  %v715_v41 = vadd.f32 %v2447_v29, %v2564_v34 }
 0x213   : > { %v1704_v46 = vpop.f32.mrf.mxu0  ;;  %1850 = vtanh.f32 %v1069_v23 }
 0x214   : > { %v1291_v0 = vadd.f32 %v1704_v46, %v695_v24  ;;  %v710_v24 = vadd.f32 %v2449_v30, %v2564_v34 }
 0x215   : > { %v1219_v1 = vpop.f32.mrf.mxu0 }
 0x216   : > { %1852 = vtanh.f32 %v1291_v0  ;;  %v1290_v18 = vadd.f32 %v1219_v1, %v690_v9  ;;  %v1073_v9 = vmul.f32 0.5, %v2530_v48  ;;  %v1339_v1 = vmul.f32 %v2584_v26, %v1322_v37 }
 0x217   : > { %1854 = vtanh.f32 %v1070_v21  ;;  %v1340_v21 = vmul.f32 %v2584_v26, %v1323_v28 }
 0x218   : > { %1856 = vtanh.f32 %v1290_v18 }
 0x21b   : > { %v1843_v40 = vpop.eup %1842  ;;  %v1707_v54 = vpop.f32.mrf.mxu0 }
 0x21c   : > { %v1354_v16 = vsub.f32 %v1843_v40, %v2327_v56  ;;  %v1293_v4 = vadd.f32 %v1707_v54, %v705_v19  ;;  %v1076_v19 = vmul.f32 0.5, %v2545_v8 }
 0x21d   : > { %v1845_v47 = vpop.eup %1844  ;;  %v1229_v7 = vpop.f32.mrf.mxu0 }
 0x21e   : > { %v1847_v61 = vpop.eup %1846  ;;  %v1370_v5 = vmul.f32 %v1354_v16, %v1338_v2  ;;  %v1353_v6 = vsub.f32 %v1845_v47, %v2319_v55  ;;  %1858 = vtanh.f32 %v1293_v4  ;;  %v1292_v35 = vadd.f32 %v1229_v7, %v700_v3  ;;  %v964_v2 = vpop.f32.mrf.mxu1 }
 0x21f   : > { %v1849_v31 = vpop.eup %1848  ;;  %1860 = vtanh.f32 %v1072_v52  ;;  %v1100_v44 = vadd.f32 1.0, %v1847_v61  ;;  %v1075_v3 = vmul.f32 0.5, %v2540_v39  ;;  %v2751_v61 = vld [vmem:[#allocation13_spill] sm:$0xff] }
 0x220   : > { %v1386_v63 = vadd.f32 %v1370_v5, %v2327_v56  ;;  %v1369_v49 = vmul.f32 %v1353_v6, %v1337_v27  ;;  %1862 = vtanh.f32 %v1292_v35  ;;  %v1099_v43 = vadd.f32 1.0, %v1849_v31  ;;  %v1851_v20 = vpop.eup %1850 }
 0x221   : > { %1864 = vtanh.f32 %v1071_v14  ;;  %v1074_v56 = vmul.f32 0.5, %v2535_v15  ;;  %v1116_v46 = vmul.f32 0.5, %v1100_v44  ;;  %v1101_v53 = vadd.f32 1.0, %v1851_v20  ;;  %v2752_v44 = vld [vmem:[#allocation14_spill] sm:$0xff] }
 0x222   : > { %1402 = vst [vmem:[%s2599_s23 + $0x8] sm:$0xff] %v1386_v63  ;;  %v1385_v17 = vadd.f32 %v1369_v49, %v2319_v55  ;;  %v1115_v33 = vmul.f32 0.5, %v1099_v43  ;;  %v720_v8 = vadd.f32 %v2751_v61, %v2564_v34  ;;  %v1900_v61 = vld [vmem:[%s2310_s15 + $0x48] sm:$0xff] }
 0x223   : > { %v1710_v42 = vpop.f32.mrf.mxu0  ;;  %v1853_v23 = vpop.eup %1852  ;;  %v1325_v25 = vsub.f32 1.0, %v1116_v46  ;;  %v1117_v54 = vmul.f32 0.5, %v1101_v53 }
 0x224   : > { %1401 = vst [vmem:[%s2599_s23] sm:$0xff] %v1385_v17  ;;  %v1295_v29 = vadd.f32 %v1710_v42, %v715_v41  ;;  %v1855_v10 = vpop.eup %1854  ;;  %v1356_v55 = vsub.f32 %v1853_v23, %v2343_v58  ;;  %v1324_v40 = vsub.f32 1.0, %v1115_v33  ;;  %v735_v41 = vadd.f32 %v2752_v44, %v2564_v34  ;;  %v2753_v23 = vld [vmem:[#allocation15_spill] sm:$0xff]  ;;  %v1898_v33 = vld [vmem:[%s2310_s15 + $0x30] sm:$0xff] }
 0x225   : > { %v1239_v0 = vpop.f32.mrf.mxu0  ;;  %v1857_v13 = vpop.eup %1856  ;;  %v1102_v38 = vadd.f32 1.0, %v1855_v10  ;;  %v1342_v27 = vmul.f32 %v2584_v26, %v1325_v25  ;;  %v1326_v14 = vsub.f32 1.0, %v1117_v54 }
 0x226   : > { %1866 = vtanh.f32 %v1295_v29  ;;  %v1294_v15 = vadd.f32 %v1239_v0, %v710_v24  ;;  %v1372_v30 = vmul.f32 %v1356_v55, %v1340_v21  ;;  %v1355_v18 = vsub.f32 %v1857_v13, %v2335_v57 }
 0x227   : > { %1868 = vtanh.f32 %v1074_v56  ;;  %v1118_v47 = vmul.f32 0.5, %v1102_v38  ;;  %v1341_v6 = vmul.f32 %v2584_v26, %v1324_v40  ;;  %v730_v24 = vadd.f32 %v2753_v23, %v2564_v34 }
 0x228   : > { %1870 = vtanh.f32 %v1294_v15  ;;  %v1388_v48 = vadd.f32 %v1372_v30, %v2343_v58  ;;  %v1371_v50 = vmul.f32 %v1355_v18, %v1339_v1  ;;  %v611_v58 = vadd.f32 %v2567_v11, %v2479_v51  ;;  %v1899_v18 = vld [vmem:[%s2310_s15 + $0x38] sm:$0xff] }
 0x229   : > { %1872 = vtanh.f32 %v1073_v9  ;;  %v1327_v35 = vsub.f32 1.0, %v1118_v47  ;;  %v1343_v46 = vmul.f32 %v2584_v26, %v1326_v14  ;;  %v1077_v55 = vmul.f32 0.5, %v2550_v36  ;;  %v2754_v36 = vld [vmem:[#allocation16_spill] sm:$0xff] }
 0x22a   : > { %1404 = vst [vmem:[%s2599_s23 + $0x18] sm:$0xff] %v1388_v48  ;;  %v1387_v52 = vadd.f32 %v1371_v50, %v2335_v57  ;;  %1874 = vtanh.f32 %v1076_v19  ;;  %v1062_v7 = vadd.f32 %v964_v2, %v611_v58  ;;  %v745_v50 = vadd.f32 %v2754_v36, %v2564_v34 }
 0x22b   : > { %v1859_v16 = vpop.eup %1858  ;;  %v1713_v12 = vpop.f32.mrf.mxu0 }
 0x22c   : > { %v1861_v4 = vpop.eup %1860  ;;  %1403 = vst [vmem:[%s2599_s23 + $0x10] sm:$0xff] %v1387_v52  ;;  %v1358_v32 = vsub.f32 %v1859_v16, %v2359_v60  ;;  %v1297_v5 = vadd.f32 %v1713_v12, %v725_v22  ;;  %v1078_v20 = vmul.f32 0.5, %v1062_v7  ;;  %v2755_v16 = vld [vmem:[#allocation17_spill] sm:$0xff] }
 0x22d   : > { %v1863_v57 = vpop.eup %1862  ;;  %v1249_v39 = vpop.f32.mrf.mxu0  ;;  %v1104_v63 = vadd.f32 1.0, %v1861_v4  ;;  %v740_v54 = vadd.f32 %v2755_v16, %v2564_v34 }
 0x22e   : > { %v1374_v31 = vmul.f32 %v1358_v32, %v1342_v27  ;;  %v1357_v51 = vsub.f32 %v1863_v57, %v2351_v59  ;;  %1876 = vtanh.f32 %v1297_v5  ;;  %v1296_v11 = vadd.f32 %v1249_v39, %v720_v8  ;;  %v1865_v45 = vpop.eup %1864  ;;  %v1901_v39 = vld [vmem:[%s2310_s15 + $0x40] sm:$0xff] }
 0x22f   : > { %1878 = vtanh.f32 %v1075_v3  ;;  %v1103_v17 = vadd.f32 1.0, %v1865_v45  ;;  %v1120_v9 = vmul.f32 0.5, %v1104_v63  ;;  %v2756_v63 = vld [vmem:[#allocation18_spill] sm:$0xff] }
 0x230   : > { %v1390_v49 = vadd.f32 %v1374_v31, %v2359_v60  ;;  %v1373_v28 = vmul.f32 %v1357_v51, %v1341_v6  ;;  %1880 = vtanh.f32 %v1296_v11  ;;  %v1344_v60 = vmul.f32 %v2584_v26, %v1327_v35 }
 0x231   : > { %v1119_v30 = vmul.f32 0.5, %v1103_v17  ;;  %v1329_v25 = vsub.f32 1.0, %v1120_v9  ;;  %v1903_v9 = vld [vmem:[%s2310_s15 + $0x50] sm:$0xff] }
 0x232   : > { %1406 = vst [vmem:[%s2599_s23 + $0x28] sm:$0xff] %v1390_v49  ;;  %v1389_v37 = vadd.f32 %v1373_v28, %v2351_v59  ;;  %v755_v49 = vadd.f32 %v2756_v63, %v2564_v34 }
 0x233   : > { %v1867_v43 = vpop.eup %1866  ;;  %v1716_v56 = vpop.f32.mrf.mxu0  ;;  %v1328_v22 = vsub.f32 1.0, %v1119_v30  ;;  %v1346_v12 = vmul.f32 %v2584_v26, %v1329_v25  ;;  %v1904_v25 = vld [vmem:[%s2310_s15 + $0x68] sm:$0xff] }
 0x234   : > { %v1869_v42 = vpop.eup %1868  ;;  %v1360_v29 = vsub.f32 %v1867_v43, %v2375_v62  ;;  %v1299_v10 = vadd.f32 %v1716_v56, %v735_v41  ;;  %1405 = vst [vmem:[%s2599_s23 + $0x20] sm:$0xff] %v1389_v37 }
 0x235   : > { %v1871_v21 = vpop.eup %1870  ;;  %v1259_v0 = vpop.f32.mrf.mxu0  ;;  %v1106_v62 = vadd.f32 1.0, %v1869_v42  ;;  %v1345_v57 = vmul.f32 %v2584_v26, %v1328_v22  ;;  %v1902_v42 = vld [vmem:[%s2310_s15 + $0x58] sm:$0xff]  ;;  %v1905_v22 = vld [vmem:[%s2310_s15 + $0x60] sm:$0xff] }
 0x236   : > { %v1873_v59 = vpop.eup %1872  ;;  %v1376_v13 = vmul.f32 %v1360_v29, %v1344_v60  ;;  %v1359_v15 = vsub.f32 %v1871_v21, %v1898_v33  ;;  %1882 = vtanh.f32 %v1299_v10  ;;  %v1298_v1 = vadd.f32 %v1259_v0, %v730_v24 }
 0x237   : > { %1884 = vtanh.f32 %v1078_v20  ;;  %v1105_v48 = vadd.f32 1.0, %v1873_v59  ;;  %v1875_v19 = vpop.eup %1874  ;;  %v1122_v47 = vmul.f32 0.5, %v1106_v62  ;;  %v2757_v20 = vld [vmem:[#allocation19_spill] sm:$0xff] }
 0x238   : > { %v1392_v53 = vadd.f32 %v1899_v18, %v1376_v13  ;;  %v1375_v38 = vmul.f32 %v1359_v15, %v1343_v46  ;;  %1886 = vtanh.f32 %v1298_v1  ;;  %v1108_v6 = vadd.f32 1.0, %v1875_v19 }
 0x239   : > { %1888 = vtanh.f32 %v1077_v55  ;;  %v1121_v4 = vmul.f32 0.5, %v1105_v48  ;;  %v1331_v51 = vsub.f32 1.0, %v1122_v47  ;;  %v750_v37 = vadd.f32 %v2757_v20, %v2564_v34 }
 0x23a   : > { %1408 = vst [vmem:[%s2599_s23 + $0x38] sm:$0xff] %v1392_v53  ;;  %v1391_v40 = vadd.f32 %v1898_v33, %v1375_v38  ;;  %v1124_v44 = vmul.f32 0.5, %v1108_v6 }
 0x23b   : > { %v1719_v2 = vpop.f32.mrf.mxu0  ;;  %v1877_v52 = vpop.eup %1876  ;;  %v1330_v11 = vsub.f32 1.0, %v1121_v4  ;;  %v1348_v56 = vmul.f32 %v2584_v26, %v1331_v51  ;;  %v1906_v4 = vld [vmem:[%s2310_s15 + $0x78] sm:$0xff] }
 0x23c   : > { %1407 = vst [vmem:[%s2599_s23 + $0x30] sm:$0xff] %v1391_v40  ;;  %v1301_v3 = vadd.f32 %v1719_v2, %v745_v50  ;;  %v1879_v58 = vpop.eup %1878  ;;  %v1362_v8 = vsub.f32 %v1877_v52, %v1900_v61  ;;  %v1333_v59 = vsub.f32 1.0, %v1124_v44 }
 0x23d   : > { %v1269_v27 = vpop.f32.mrf.mxu0  ;;  %v1881_v32 = vpop.eup %1880  ;;  %v1107_v45 = vadd.f32 1.0, %v1879_v58  ;;  %v1347_v29 = vmul.f32 %v2584_v26, %v1330_v11 }
 0x23e   : > { %1890 = vtanh.f32 %v1301_v3  ;;  %v1300_v5 = vadd.f32 %v1269_v27, %v740_v54  ;;  %v1378_v7 = vmul.f32 %v1362_v8, %v1346_v12  ;;  %v1361_v31 = vsub.f32 %v1881_v32, %v1901_v39 }
 0x23f   : > { %v1123_v10 = vmul.f32 0.5, %v1107_v45  ;;  %v1350_v53 = vmul.f32 %v2584_v26, %v1333_v59 }
 0x240   : > { %1892 = vtanh.f32 %v1300_v5  ;;  %v1394_v14 = vadd.f32 %v1900_v61, %v1378_v7  ;;  %v1377_v35 = vmul.f32 %v1361_v31, %v1345_v57  ;;  %v1907_v5 = vld [vmem:[%s2310_s15 + $0x70] sm:$0xff]  ;;  %s1992_s15 = scalar_lea.vmem %s1991_s10, 4096 }
 0x241   : > { %v1332_v1 = vsub.f32 1.0, %v1123_v10  ;;  %p1994_p9 = scmp.lt.s32.totalorder %s1992_s15, %s1986_s0 }
 0x242   : > { %1410 = vst [vmem:[%s2599_s23 + $0x48] sm:$0xff] %v1394_v14  ;;  %v1393_v41 = vadd.f32 %v1901_v39, %v1377_v35 }
 0x243   : > { %v1883_v28 = vpop.eup %1882  ;;  %v1722_v43 = vpop.f32.mrf.mxu0  ;;  %v1349_v50 = vmul.f32 %v2584_v26, %v1332_v1  ;;  %p1995_p8 = por %p1994_p9, %p1993_p6 }
 0x244   : > { %v1885_v17 = vpop.eup %1884  ;;  %v1364_v23 = vsub.f32 %v1883_v28, %v1902_v42  ;;  %v1303_v24 = vadd.f32 %v1722_v43, %v755_v49  ;;  %1409 = vst [vmem:[%s2599_s23 + $0x40] sm:$0xff] %v1393_v41 }
 0x245   : > { %v1887_v60 = vpop.eup %1886  ;;  %v1279_v21 = vpop.f32.mrf.mxu0  ;;  %v1110_v13 = vadd.f32 1.0, %v1885_v17  ;;  %p1996_p11 = pnand %p1995_p8, %p1989_p7 }
 0x246   : > { %v1380_v46 = vmul.f32 %v1364_v23, %v1348_v56  ;;  %v1363_v55 = vsub.f32 %v1887_v60, %v1903_v9  ;;  %1894 = vtanh.f32 %v1303_v24  ;;  %v1302_v0 = vadd.f32 %v1279_v21, %v750_v37  ;;  %v1889_v34 = vpop.eup %1888 }
 0x247   : > { %v1109_v30 = vadd.f32 1.0, %v1889_v34  ;;  %v1126_v38 = vmul.f32 0.5, %v1110_v13 }
 0x248   : > { %v1396_v33 = vadd.f32 %v1902_v42, %v1380_v46  ;;  %v1379_v15 = vmul.f32 %v1363_v55, %v1347_v29  ;;  %1896 = vtanh.f32 %v1302_v0 }
 0x249   : > { %v1125_v40 = vmul.f32 0.5, %v1109_v30  ;;  %v1335_v52 = vsub.f32 1.0, %v1126_v38 }
 0x24a   : > { %1412 = vst [vmem:[%s2599_s23 + $0x58] sm:$0xff] %v1396_v33  ;;  %v1395_v62 = vadd.f32 %v1903_v9, %v1379_v15 }
 0x24b   : > { %v1891_v18 = vpop.eup %1890  ;;  %v1334_v47 = vsub.f32 1.0, %v1125_v40  ;;  %v1352_v12 = vmul.f32 %v2584_v26, %v1335_v52 }
 0x24c   : > { %1411 = vst [vmem:[%s2599_s23 + $0x50] sm:$0xff] %v1395_v62  ;;  %v1366_v48 = vsub.f32 %v1891_v18, %v1904_v25 }
 0x24d   : > { %v1893_v36 = vpop.eup %1892  ;;  %v1351_v27 = vmul.f32 %v2584_v26, %v1334_v47 }
 0x24e   : > { %v1382_v19 = vmul.f32 %v1366_v48, %v1350_v53  ;;  %v1365_v2 = vsub.f32 %v1893_v36, %v1905_v22 }
 0x250   : > { %v1398_v16 = vadd.f32 %v1904_v25, %v1382_v19  ;;  %v1381_v54 = vmul.f32 %v1365_v2, %v1349_v50 }
 0x252   : > { %1414 = vst [vmem:[%s2599_s23 + $0x68] sm:$0xff] %v1398_v16  ;;  %v1397_v3 = vadd.f32 %v1905_v22, %v1381_v54 }
 0x253   : > { %v1895_v58 = vpop.eup %1894 }
 0x254   : > { %1413 = vst [vmem:[%s2599_s23 + $0x60] sm:$0xff] %v1397_v3  ;;  %v1368_v61 = vsub.f32 %v1895_v58, %v1906_v4 }
 0x255   : > { %v1897_v8 = vpop.eup %1896 }
 0x256   : > { %v1384_v32 = vmul.f32 %v1368_v61, %v1352_v12  ;;  %v1367_v57 = vsub.f32 %v1897_v8, %v1907_v5 }
 0x258   : > { %v1400_v6 = vadd.f32 %v1906_v4, %v1384_v32  ;;  %v1383_v7 = vmul.f32 %v1367_v57, %v1351_v27 }
 0x25a   : > { %1416 = vst [vmem:[%s2599_s23 + $0x78] sm:$0xff] %v1400_v6  ;;  %v1399_v26 = vadd.f32 %v1907_v5, %v1383_v7 }
 0x25c   : > { %1415 = vst [vmem:[%s2599_s23 + $0x70] sm:$0xff] %v1399_v26 }
 0x25d   : > { %1999 = shalt.err (!%p1996_p11)
}
 0x25e   : > { %s2000_s16 = scalar_lea.hbm %s2679_s25, 2048  ;;  %s2004_s21 = scalar_lea.hbm %s2734_s7, 4096 }
 0x25f   : > { %p2001_p0 = scmp.ne.s32.totalorder %s2679_s25, %s2000_s16  ;;  %p2005_p3 = scmp.lt.s32.totalorder %s2679_s25, %s2734_s7 }
 0x260   : > { %p2006_p2 = scmp.lt.s32.totalorder %s2004_s21, %s2000_s16 }
 0x261   : > { %p2002_p1 = pnand %p2001_p0, %p2150_p5 }
 0x262   : > { %p2007_p4 = por %p2006_p2, %p2005_p3 }
 0x263   : > { %p2003_p13 = pneg %p2002_p1 }
 0x265   : > { %p2008_p10 = pnand %p2007_p4, %p2003_p13 }
 0x267   : > { %2011 = shalt.err (!%p2008_p10)
}
 0x268   : > { %s2067_s19 = smov 128   ;;  %s2068_s14 = smov 8  }
 0x269   : > { %1735 = dma.vmem_to_hbm [thread:$0]  (%p2150_p5), %s2681_s17, 2048, %s2679_s25, %s2687_s30, %s2067_s19, %s2067_s19, %s2068_s14  }
 0x26a PF: > { %p1757_p12 = scmp.ge.s32.totalorder %s2054_s29, 2  ;;  %s1446_s24 = sand.u32 1, %s2042_s26  }
 0x26b   : > { %p2758_p7 = scmp.ne.s32.totalorder %s2737_s13, 0  ;;  %s1447_s0 = scalar_lea.sflag [#allocation5], %s1446_s24 }
 0x26d   : > { %p1748_p6 = pnand %p1757_p12, %p2758_p7 }
 0x26f   : > { %p1749_p9 = pneg %p1748_p6 }
 0x271   : > { %2037 = dma.done.wait (%p1749_p9), %s1447_s0, 2048  }
 0x272   : > { %2039 = vsyncadd (%p1749_p9), %s1447_s0, 4294965248  ;;  %p20_p8 = scmp.ge.s32.totalorder %s2137_s8, 4   ;;  %s2759_s26 = smov %s2046_s27 }
 0x273   : > { %s2760_s27 = smov %s2050_s28  ;;  %s2761_s28 = smov %s2148_s11 }
 0x274   : > { %s2762_s29 = smov %s2137_s8  ;;  %22 = sbr.rel (!%p20_p8) target bundleno = 7 (0x7), region = 99 }
 0x279   :  { %1452 = vsyncpa [#allocation4], 1 }
 0x27a   :  { %1454 = vsyncpa [#allocation4 + $0x1], 1 }
 0x27b   :  { %1455 = vsyncpa [#allocation7], 1 }
 0x27c   :  { %1456 = vsyncpa [#allocation5], 1 }
 0x27d   :  { %1458 = vsyncpa [#allocation5 + $0x1], 1 }

</bundles_post_ra>
